<compile_context>
chip_gen: v7x
topology: tpu7x:2x2x1
jax: 0.10.0
libtpu: 0.0.40
codegen_flags: <defaults>
</compile_context>

<pallas_src>
import jax
import jax.numpy as jnp
from jax.experimental import pallas as pl
from jax.experimental.pallas import tpu as pltpu

EPS = 1e-5

# MXU operand dtype for the two convolutions.  bf16 halves the dominant
# (weight) HBM->VMEM DMA and uses the native bf16 MXU on all generations;
# accumulation stays f32.  Because the training-mode BN that follows each conv
# rescales activations to unit variance, the conv's ~2^-8 relative bf16
# rounding error appears as ~1e-2 ABSOLUTE deviation versus a pure-f32
# reference -- expected, not a bug.  Set to jnp.float32 to recover ~1e-6
# agreement (at 2x the weight DMA and the slower multi-pass f32 MXU path).
CONV_DTYPE = jnp.bfloat16


# ----------------------------- one-time weight prep ---------------------------

def _banded_weights(w_hwio, W):
    """Fold the kx taps + 'SAME' padding along W into one (3*W*Ci, W*Co) matrix.

    Row index = ky*(W*Ci) + wi*Ci + ci, col index = w*Co + co, value
    w_hwio[ky, wi - w + 1, ci, co] when |wi - w| <= 1, else 0, so that
        conv3x3(x) = concat_lanes([x_rows(-1), x, x_rows(+1)]) @ Wbanded
    on the (N*H, W*C) activation slab.  Built with a single gather + mask
    (no per-call dynamic-update-slice scatter loop).
    """
    kh, kw, Ci, Co = w_hwio.shape
    dx = jnp.arange(W)[:, None] - jnp.arange(W)[None, :]        # dx[wi, w] = wi - w
    valid = jnp.abs(dx) <= (kw // 2)                            # (W, W)
    kx = jnp.clip(dx + kw // 2, 0, kw - 1)                      # (W, W)
    blocks = w_hwio[:, kx]                                      # (kh, W, W, Ci, Co) [ky, wi, w, ci, co]
    blocks = jnp.where(valid[None, :, :, None, None], blocks, 0.0)
    blocks = blocks.transpose(0, 1, 3, 2, 4)                    # (kh, W, Ci, W, Co)
    return blocks.reshape(kh * W * Ci, W * Co)


def prepare_basic_block_params(w1_hwio, b1, g1, be1, w2_hwio, b2, g2, be2, *, W,
                               conv_dtype=CONV_DTYPE):
    """One-time layout prep -- hoist this out of the per-step hot path.

    Conv biases b1/b2 are accepted for interface parity but unused: a
    per-channel conv bias cancels exactly under the training-mode BatchNorm
    mean subtraction that follows each conv (eval-mode running stats would NOT
    cancel it)."""
    del b1, b2
    C = w1_hwio.shape[2]

    def tile_c(v):  # (C,) -> (1, W*C), matching the lane layout w*C + c
        return jnp.tile(v.reshape(1, C).astype(jnp.float32), (1, W))

    return (_banded_weights(w1_hwio.astype(jnp.float32), W).astype(conv_dtype),
            tile_c(g1), tile_c(be1),
            _banded_weights(w2_hwio.astype(jnp.float32), W).astype(conv_dtype),
            tile_c(g2), tile_c(be2))


# --------------------------------- kernel ------------------------------------

def _make_kernel(N, H, W, C):
    NH, WC = N * H, W * C
    inv_count = 1.0 / float(N * H * W)

    def conv3x3(x, w_ref, up_ok, dn_ok, zero_row):
        """3x3 'SAME' conv on the (NH, WC) slab as ONE MXU matmul.

        The dy = -1/0/+1 taps are +-1 row (sublane) shifts of the slab, zeroed
        at image boundaries by the masks; the kx taps + W-padding live in the
        block-banded weights.  [up | mid | dn] concatenated along lanes makes
        the three dy contributions one K = 3*W*C accumulation chain."""
        up = jnp.where(up_ok, jnp.concatenate([zero_row, x[:-1, :]], axis=0), 0.0)
        dn = jnp.where(dn_ok, jnp.concatenate([x[1:, :], zero_row], axis=0), 0.0)
        w = w_ref[...]                                          # (3*WC, WC), CONV_DTYPE
        lhs = jnp.concatenate([up, x, dn], axis=1).astype(w.dtype)
        return jnp.dot(lhs, w, preferred_element_type=jnp.float32)

    def bn_train(y, gamma, beta):
        """Training-mode BatchNorm2d on the (NH, WC) slab, fused single pass.

        Per-channel sums over the W-interleaved lane groups are reduced AND
        broadcast back in one shot with log2(W) cyclic lane rolls (XLU slot):
        after the roll-reduce, every lane w*C + c holds the channel-c total.
        gamma/beta arrive pre-tiled to (1, WC); elementwise math stays f32."""
        s = jnp.sum(y, axis=0, keepdims=True)                   # (1, WC)
        s2 = jnp.sum(y * y, axis=0, keepdims=True)              # (1, WC)
        row = jnp.concatenate([s, s2], axis=0)                  # (2, WC)
        shift = C
        while shift < WC:                                       # C, 2C, ... (log2(W) steps)
            row = row + pltpu.roll(row, shift, axis=1)
            shift *= 2
        mean = row[0:1, :] * inv_count
        var = jnp.maximum(row[1:2, :] * inv_count - mean * mean, 0.0)
        scale = gamma * jax.lax.rsqrt(var + EPS)                # rsqrt -> EUP slot
        shift_b = beta - mean * scale
        return y * scale + shift_b                              # one FMA over the slab

    def kernel(x_ref, w1_ref, g1_ref, be1_ref, w2_ref, g2_ref, be2_ref, o_ref):
        x = x_ref[...]                                          # (NH, WC) f32

        # +-1 row (dy) taps must not cross image (h) boundaries.
        row_h = jax.lax.broadcasted_iota(jnp.int32, (NH, 1), 0) % H
        up_ok = row_h >= 1
        dn_ok = row_h < H - 1
        zero_row = jnp.zeros((1, WC), jnp.float32)

        # conv1 -> BN -> ReLU  (conv bias dropped: cancels under training BN)
        y = conv3x3(x, w1_ref, up_ok, dn_ok, zero_row)
        y = bn_train(y, g1_ref[...], be1_ref[...])
        y = jnp.maximum(y, 0.0)

        # conv2 -> BN
        y = conv3x3(y, w2_ref, up_ok, dn_ok, zero_row)
        y = bn_train(y, g2_ref[...], be2_ref[...])

        # residual add + ReLU; dense, lane-aligned (NH, WC) store
        o_ref[...] = jnp.maximum(y + x, 0.0).astype(o_ref.dtype)

    return kernel


# --------------------------------- wrapper -----------------------------------

@jax.jit
def basic_block(x_nhwc, params):
    """BasicBlock forward with pre-prepared params (see prepare_basic_block_params)."""
    N, H, W, C = x_nhwc.shape
    assert W & (W - 1) == 0, "BN lane roll-reduce assumes W is a power of two"
    NH, WC = N * H, W * C
    w1b, g1t, be1t, w2b, g2t, be2t = params

    # Free row-major metadata reshape: NHWC -> lane-dense (N*H, W*C) slab.
    x2d = x_nhwc.reshape(NH, WC).astype(jnp.float32)

    vspec = pl.BlockSpec(memory_space=pltpu.MemorySpace.VMEM)
    out2d = pl.pallas_call(
        _make_kernel(N, H, W, C),
        out_shape=jax.ShapeDtypeStruct((NH, WC), jnp.float32),
        in_specs=[vspec] * 7,
        out_specs=vspec,
    )(x2d, w1b, g1t, be1t, w2b, g2t, be2t)

    return out2d.reshape(N, H, W, C).astype(x_nhwc.dtype)


# ------------------------------- reference -----------------------------------

def reference(x, w1_hwio, b1, g1, be1, w2_hwio, b2, g2, be2):
    """Pure-JAX f32 reference of the same forward pass (for correctness check)."""
    def conv(x, w, b):
        y = jax.lax.conv_general_dilated(
            x, w, (1, 1), 'SAME', dimension_numbers=('NHWC', 'HWIO', 'NHWC'))
        return y + b
    def bn(x, g, be):
        mean = jnp.mean(x, axis=(0, 1, 2), keepdims=True)
        var = jnp.mean((x - mean) ** 2, axis=(0, 1, 2), keepdims=True)
        return (x - mean) * jax.lax.rsqrt(var + EPS) * g + be
    h = jax.nn.relu(bn(conv(x, w1_hwio, b1), g1, be1))
    h = bn(conv(h, w2_hwio, b2), g2, be2)
    return jax.nn.relu(h + x)


if __name__ == "__main__":
    # Small shapes: chess board 8x8 spatial, channels scaled down 256 -> 32.
    N, H, W, C = 2, 8, 8, 32
    key = jax.random.PRNGKey(0)
    k_x, k_w1, k_b1, k_w2, k_b2 = jax.random.split(key, 5)

    x = jax.random.normal(k_x, (N, H, W, C), jnp.float32)

    fan_in = C * 9
    bound = float(1.0 / (fan_in ** 0.5))   # PyTorch Conv2d default init range
    w1 = jax.random.uniform(k_w1, (3, 3, C, C), jnp.float32, -bound, bound)
    b1 = jax.random.uniform(k_b1, (C,), jnp.float32, -bound, bound)
    w2 = jax.random.uniform(k_w2, (3, 3, C, C), jnp.float32, -bound, bound)
    b2 = jax.random.uniform(k_b2, (C,), jnp.float32, -bound, bound)
    g1 = jnp.ones((C,), jnp.float32); be1 = jnp.zeros((C,), jnp.float32)
    g2 = jnp.ones((C,), jnp.float32); be2 = jnp.zeros((C,), jnp.float32)

    # One-time layout prep (would be hoisted out of the step loop in a network).
    params = jax.block_until_ready(
        prepare_basic_block_params(w1, b1, g1, be1, w2, b2, g2, be2, W=W))

    out = jax.block_until_ready(basic_block(x, params))
    ref = jax.block_until_ready(reference(x, w1, b1, g1, be1, w2, b2, g2, be2))

    # bf16 MXU operands + BatchNorm's unit-variance rescaling put the expected
    # deviation vs the f32 reference at the ~1e-2 level (see CONV_DTYPE note);
    # f32 operands recover ~1e-6 and the tighter tolerance below.
    tol = 3e-2 if CONV_DTYPE == jnp.bfloat16 else 1e-3
    max_err = float(jnp.max(jnp.abs(out - ref)))
    assert jnp.allclose(out, ref, atol=tol, rtol=tol), f"max_err={max_err}"
    print("KERNEL_OK")
</pallas_src>

<mosaic_0001>
module attributes {stable_mosaic.version = 11 : i64} {
  func.func @kernel(%arg0: memref<16x256xf32, #tpu.memory_space<vmem>>, %arg1: memref<768x256xbf16, #tpu.memory_space<vmem>>, %arg2: memref<1x256xf32, #tpu.memory_space<vmem>>, %arg3: memref<1x256xf32, #tpu.memory_space<vmem>>, %arg4: memref<768x256xbf16, #tpu.memory_space<vmem>>, %arg5: memref<1x256xf32, #tpu.memory_space<vmem>>, %arg6: memref<1x256xf32, #tpu.memory_space<vmem>>, %arg7: memref<16x256xf32, #tpu.memory_space<vmem>>) attributes {dimension_semantics = [], scalar_prefetch = 0 : i64, scratch_operands = 0 : i64, tpu.core_type = #tpu.core_type<tc>} {
    %c0 = arith.constant 0 : index
    %c0_0 = arith.constant 0 : index
    %0 = vector.load %arg0[%c0, %c0_0] : memref<16x256xf32, #tpu.memory_space<vmem>>, vector<16x256xf32>
    %1 = tpu.iota {dimensions = array<i32: 0>} : vector<16x1xi32>
    %c8_i32 = arith.constant 8 : i32
    %c0_i32 = arith.constant 0 : i32
    %2 = arith.cmpi eq, %c8_i32, %c0_i32 : i32
    %c1_i32 = arith.constant 1 : i32
    %3 = arith.select %2, %c1_i32, %c8_i32 : i32
    %4 = vector.broadcast %3 : i32 to vector<16x1xi32>
    %5 = arith.remsi %1, %4 : vector<16x1xi32>
    %c0_i32_1 = arith.constant 0 : i32
    %6 = vector.broadcast %c0_i32_1 : i32 to vector<16x1xi32>
    %7 = arith.cmpi ne, %5, %6 : vector<16x1xi32>
    %c0_i32_2 = arith.constant 0 : i32
    %8 = vector.broadcast %c0_i32_2 : i32 to vector<16x1xi32>
    %9 = arith.cmpi slt, %5, %8 : vector<16x1xi32>
    %c0_i32_3 = arith.constant 0 : i32
    %10 = arith.cmpi slt, %3, %c0_i32_3 : i32
    %11 = vector.broadcast %10 : i1 to vector<16x1xi1>
    %12 = vector.broadcast %11 : vector<16x1xi1> to vector<16x1xi1>
    %13 = arith.xori %9, %12 : vector<16x1xi1>
    %14 = arith.andi %13, %7 : vector<16x1xi1>
    %15 = vector.broadcast %3 : i32 to vector<16x1xi32>
    %16 = arith.addi %5, %15 : vector<16x1xi32>
    %17 = arith.select %14, %16, %5 : vector<16x1xi1>, vector<16x1xi32>
    %c1_i32_4 = arith.constant 1 : i32
    %18 = vector.broadcast %c1_i32_4 : i32 to vector<16x1xi32>
    %19 = arith.cmpi sge, %17, %18 : vector<16x1xi32>
    %c7_i32 = arith.constant 7 : i32
    %20 = vector.broadcast %c7_i32 : i32 to vector<16x1xi32>
    %21 = arith.cmpi slt, %17, %20 : vector<16x1xi32>
    %cst = arith.constant 0.000000e+00 : f32
    %22 = vector.broadcast %cst : f32 to vector<1x256xf32>
    %23 = vector.extract_strided_slice %0 {offsets = [0, 0], sizes = [15, 256], strides = [1, 1]} : vector<16x256xf32> to vector<15x256xf32>
    %24 = tpu.concatenate %22, %23 in 0 : vector<1x256xf32>, vector<15x256xf32> -> vector<16x256xf32>
    %cst_5 = arith.constant 0.000000e+00 : f32
    %25 = vector.shape_cast %19 : vector<16x1xi1> to vector<16x1xi1>
    %26 = vector.broadcast %25 : vector<16x1xi1> to vector<16x256xi1>
    %27 = vector.broadcast %cst_5 : f32 to vector<16x256xf32>
    %28 = arith.select %26, %24, %27 : vector<16x256xi1>, vector<16x256xf32>
    %29 = vector.extract_strided_slice %0 {offsets = [1, 0], sizes = [15, 256], strides = [1, 1]} : vector<16x256xf32> to vector<15x256xf32>
    %30 = tpu.concatenate %29, %22 in 0 : vector<15x256xf32>, vector<1x256xf32> -> vector<16x256xf32>
    %cst_6 = arith.constant 0.000000e+00 : f32
    %31 = vector.shape_cast %21 : vector<16x1xi1> to vector<16x1xi1>
    %32 = vector.broadcast %31 : vector<16x1xi1> to vector<16x256xi1>
    %33 = vector.broadcast %cst_6 : f32 to vector<16x256xf32>
    %34 = arith.select %32, %30, %33 : vector<16x256xi1>, vector<16x256xf32>
    %c0_7 = arith.constant 0 : index
    %c0_8 = arith.constant 0 : index
    %35 = vector.load %arg1[%c0_7, %c0_8] : memref<768x256xbf16, #tpu.memory_space<vmem>>, vector<768x256xbf16>
    %36 = tpu.concatenate %28, %0, %34 in 1 : vector<16x256xf32>, vector<16x256xf32>, vector<16x256xf32> -> vector<16x768xf32>
    %37 = arith.truncf %36 : vector<16x768xf32> to vector<16x768xbf16>
    %cst_9 = arith.constant dense<0.000000e+00> : vector<16x256xf32>
    %38 = tpu.matmul %37, %35, %cst_9 {dimension_numbers = #tpu.dot_dimension_numbers<[1], [0], [0], [1], [0, 0, 1, 1], [], []>} : vector<16x768xbf16>, vector<768x256xbf16>, vector<16x256xf32> -> vector<16x256xf32>
    %c0_10 = arith.constant 0 : index
    %c0_11 = arith.constant 0 : index
    %39 = vector.load %arg2[%c0_10, %c0_11] : memref<1x256xf32, #tpu.memory_space<vmem>>, vector<1x256xf32>
    %c0_12 = arith.constant 0 : index
    %c0_13 = arith.constant 0 : index
    %40 = vector.load %arg3[%c0_12, %c0_13] : memref<1x256xf32, #tpu.memory_space<vmem>>, vector<1x256xf32>
    %cst_14 = arith.constant dense<0.000000e+00> : vector<256xf32>
    %41 = vector.multi_reduction <add>, %38, %cst_14 [0] : vector<16x256xf32> to vector<256xf32>
    %42 = vector.shape_cast %41 : vector<256xf32> to vector<1x256xf32>
    %43 = arith.mulf %38, %38 : vector<16x256xf32>
    %cst_15 = arith.constant dense<0.000000e+00> : vector<256xf32>
    %44 = vector.multi_reduction <add>, %43, %cst_15 [0] : vector<16x256xf32> to vector<256xf32>
    %45 = vector.shape_cast %44 : vector<256xf32> to vector<1x256xf32>
    %46 = tpu.concatenate %42, %45 in 0 : vector<1x256xf32>, vector<1x256xf32> -> vector<2x256xf32>
    %c32_i32 = arith.constant 32 : i32
    %47 = tpu.dynamic_rotate %46 by %c32_i32 dim 1 : vector<2x256xf32>, i32 -> vector<2x256xf32>
    %48 = arith.addf %46, %47 : vector<2x256xf32>
    %c64_i32 = arith.constant 64 : i32
    %49 = tpu.dynamic_rotate %48 by %c64_i32 dim 1 : vector<2x256xf32>, i32 -> vector<2x256xf32>
    %50 = arith.addf %48, %49 : vector<2x256xf32>
    %c128_i32 = arith.constant 128 : i32
    %51 = tpu.dynamic_rotate %50 by %c128_i32 dim 1 : vector<2x256xf32>, i32 -> vector<2x256xf32>
    %52 = arith.addf %50, %51 : vector<2x256xf32>
    %53 = vector.extract_strided_slice %52 {offsets = [0, 0], sizes = [1, 256], strides = [1, 1]} : vector<2x256xf32> to vector<1x256xf32>
    %cst_16 = arith.constant 7.812500e-03 : f32
    %54 = vector.broadcast %cst_16 : f32 to vector<1x256xf32>
    %55 = arith.mulf %53, %54 : vector<1x256xf32>
    %56 = vector.extract_strided_slice %52 {offsets = [1, 0], sizes = [1, 256], strides = [1, 1]} : vector<2x256xf32> to vector<1x256xf32>
    %cst_17 = arith.constant 7.812500e-03 : f32
    %57 = vector.broadcast %cst_17 : f32 to vector<1x256xf32>
    %58 = arith.mulf %56, %57 : vector<1x256xf32>
    %59 = arith.mulf %55, %55 : vector<1x256xf32>
    %60 = arith.subf %58, %59 : vector<1x256xf32>
    %cst_18 = arith.constant 0.000000e+00 : f32
    %61 = vector.broadcast %cst_18 : f32 to vector<1x256xf32>
    %62 = arith.maximumf %60, %61 : vector<1x256xf32>
    %cst_19 = arith.constant 9.99999974E-6 : f32
    %63 = vector.broadcast %cst_19 : f32 to vector<1x256xf32>
    %64 = arith.addf %62, %63 : vector<1x256xf32>
    %65 = math.rsqrt %64 : vector<1x256xf32>
    %66 = arith.mulf %39, %65 : vector<1x256xf32>
    %67 = arith.mulf %55, %66 : vector<1x256xf32>
    %68 = arith.subf %40, %67 : vector<1x256xf32>
    %69 = vector.broadcast %66 : vector<1x256xf32> to vector<16x256xf32>
    %70 = arith.mulf %38, %69 : vector<16x256xf32>
    %71 = vector.broadcast %68 : vector<1x256xf32> to vector<16x256xf32>
    %72 = arith.addf %70, %71 : vector<16x256xf32>
    %cst_20 = arith.constant 0.000000e+00 : f32
    %73 = vector.broadcast %cst_20 : f32 to vector<16x256xf32>
    %74 = arith.maximumf %72, %73 : vector<16x256xf32>
    %75 = vector.extract_strided_slice %74 {offsets = [0, 0], sizes = [15, 256], strides = [1, 1]} : vector<16x256xf32> to vector<15x256xf32>
    %76 = tpu.concatenate %22, %75 in 0 : vector<1x256xf32>, vector<15x256xf32> -> vector<16x256xf32>
    %cst_21 = arith.constant 0.000000e+00 : f32
    %77 = vector.shape_cast %19 : vector<16x1xi1> to vector<16x1xi1>
    %78 = vector.broadcast %77 : vector<16x1xi1> to vector<16x256xi1>
    %79 = vector.broadcast %cst_21 : f32 to vector<16x256xf32>
    %80 = arith.select %78, %76, %79 : vector<16x256xi1>, vector<16x256xf32>
    %81 = vector.extract_strided_slice %74 {offsets = [1, 0], sizes = [15, 256], strides = [1, 1]} : vector<16x256xf32> to vector<15x256xf32>
    %82 = tpu.concatenate %81, %22 in 0 : vector<15x256xf32>, vector<1x256xf32> -> vector<16x256xf32>
    %cst_22 = arith.constant 0.000000e+00 : f32
    %83 = vector.shape_cast %21 : vector<16x1xi1> to vector<16x1xi1>
    %84 = vector.broadcast %83 : vector<16x1xi1> to vector<16x256xi1>
    %85 = vector.broadcast %cst_22 : f32 to vector<16x256xf32>
    %86 = arith.select %84, %82, %85 : vector<16x256xi1>, vector<16x256xf32>
    %c0_23 = arith.constant 0 : index
    %c0_24 = arith.constant 0 : index
    %87 = vector.load %arg4[%c0_23, %c0_24] : memref<768x256xbf16, #tpu.memory_space<vmem>>, vector<768x256xbf16>
    %88 = tpu.concatenate %80, %74, %86 in 1 : vector<16x256xf32>, vector<16x256xf32>, vector<16x256xf32> -> vector<16x768xf32>
    %89 = arith.truncf %88 : vector<16x768xf32> to vector<16x768xbf16>
    %cst_25 = arith.constant dense<0.000000e+00> : vector<16x256xf32>
    %90 = tpu.matmul %89, %87, %cst_25 {dimension_numbers = #tpu.dot_dimension_numbers<[1], [0], [0], [1], [0, 0, 1, 1], [], []>} : vector<16x768xbf16>, vector<768x256xbf16>, vector<16x256xf32> -> vector<16x256xf32>
    %c0_26 = arith.constant 0 : index
    %c0_27 = arith.constant 0 : index
    %91 = vector.load %arg5[%c0_26, %c0_27] : memref<1x256xf32, #tpu.memory_space<vmem>>, vector<1x256xf32>
    %c0_28 = arith.constant 0 : index
    %c0_29 = arith.constant 0 : index
    %92 = vector.load %arg6[%c0_28, %c0_29] : memref<1x256xf32, #tpu.memory_space<vmem>>, vector<1x256xf32>
    %cst_30 = arith.constant dense<0.000000e+00> : vector<256xf32>
    %93 = vector.multi_reduction <add>, %90, %cst_30 [0] : vector<16x256xf32> to vector<256xf32>
    %94 = vector.shape_cast %93 : vector<256xf32> to vector<1x256xf32>
    %95 = arith.mulf %90, %90 : vector<16x256xf32>
    %cst_31 = arith.constant dense<0.000000e+00> : vector<256xf32>
    %96 = vector.multi_reduction <add>, %95, %cst_31 [0] : vector<16x256xf32> to vector<256xf32>
    %97 = vector.shape_cast %96 : vector<256xf32> to vector<1x256xf32>
    %98 = tpu.concatenate %94, %97 in 0 : vector<1x256xf32>, vector<1x256xf32> -> vector<2x256xf32>
    %c32_i32_32 = arith.constant 32 : i32
    %99 = tpu.dynamic_rotate %98 by %c32_i32_32 dim 1 : vector<2x256xf32>, i32 -> vector<2x256xf32>
    %100 = arith.addf %98, %99 : vector<2x256xf32>
    %c64_i32_33 = arith.constant 64 : i32
    %101 = tpu.dynamic_rotate %100 by %c64_i32_33 dim 1 : vector<2x256xf32>, i32 -> vector<2x256xf32>
    %102 = arith.addf %100, %101 : vector<2x256xf32>
    %c128_i32_34 = arith.constant 128 : i32
    %103 = tpu.dynamic_rotate %102 by %c128_i32_34 dim 1 : vector<2x256xf32>, i32 -> vector<2x256xf32>
    %104 = arith.addf %102, %103 : vector<2x256xf32>
    %105 = vector.extract_strided_slice %104 {offsets = [0, 0], sizes = [1, 256], strides = [1, 1]} : vector<2x256xf32> to vector<1x256xf32>
    %cst_35 = arith.constant 7.812500e-03 : f32
    %106 = vector.broadcast %cst_35 : f32 to vector<1x256xf32>
    %107 = arith.mulf %105, %106 : vector<1x256xf32>
    %108 = vector.extract_strided_slice %104 {offsets = [1, 0], sizes = [1, 256], strides = [1, 1]} : vector<2x256xf32> to vector<1x256xf32>
    %cst_36 = arith.constant 7.812500e-03 : f32
    %109 = vector.broadcast %cst_36 : f32 to vector<1x256xf32>
    %110 = arith.mulf %108, %109 : vector<1x256xf32>
    %111 = arith.mulf %107, %107 : vector<1x256xf32>
    %112 = arith.subf %110, %111 : vector<1x256xf32>
    %cst_37 = arith.constant 0.000000e+00 : f32
    %113 = vector.broadcast %cst_37 : f32 to vector<1x256xf32>
    %114 = arith.maximumf %112, %113 : vector<1x256xf32>
    %cst_38 = arith.constant 9.99999974E-6 : f32
    %115 = vector.broadcast %cst_38 : f32 to vector<1x256xf32>
    %116 = arith.addf %114, %115 : vector<1x256xf32>
    %117 = math.rsqrt %116 : vector<1x256xf32>
    %118 = arith.mulf %91, %117 : vector<1x256xf32>
    %119 = arith.mulf %107, %118 : vector<1x256xf32>
    %120 = arith.subf %92, %119 : vector<1x256xf32>
    %121 = vector.broadcast %118 : vector<1x256xf32> to vector<16x256xf32>
    %122 = arith.mulf %90, %121 : vector<16x256xf32>
    %123 = vector.broadcast %120 : vector<1x256xf32> to vector<16x256xf32>
    %124 = arith.addf %122, %123 : vector<16x256xf32>
    %125 = arith.addf %124, %0 : vector<16x256xf32>
    %cst_39 = arith.constant 0.000000e+00 : f32
    %126 = vector.broadcast %cst_39 : f32 to vector<16x256xf32>
    %127 = arith.maximumf %125, %126 : vector<16x256xf32>
    %c0_40 = arith.constant 0 : index
    %c0_41 = arith.constant 0 : index
    %128 = vector.load %arg7[%c0_40, %c0_41] : memref<16x256xf32, #tpu.memory_space<vmem>>, vector<16x256xf32>
    tpu.vector_store %arg7[%c0_40, %c0_41], %127 {strides = array<i32>} : memref<16x256xf32, #tpu.memory_space<vmem>>, vector<16x256xf32>,
    return
  }
}

</mosaic_0001>

<bundles_post_ra>
// kernel: basic_block.1
= control target key start
LH: loop header
LB: loop body
LE: loop exit
PB: predicated region body
PF: predicated region fallthrough
CT: control target
= control target key end

     0   :  { %12 = vsyncpa [#allocation3], 0  ;;  %s2802_s0 = inlined_call_operand.vmem [shape: f32[16,256], index: 0, kind: input, shape index: {}]   ;;  %s2803_s1 = inlined_call_operand.hbm [shape: bf16[768,256], index: 1, kind: input, shape index: {}]   ;;  %s2804_s2 = inlined_call_operand.vmem [shape: f32[1,256], index: 2, kind: input, shape index: {}]   ;;  %s2805_s3 = inlined_call_operand.vmem [shape: f32[1,256], index: 3, kind: input, shape index: {}]   ;;  %s2806_s4 = inlined_call_operand.hbm [shape: bf16[768,256], index: 4, kind: input, shape index: {}]   ;;  %s2807_s5 = inlined_call_operand.vmem [shape: f32[1,256], index: 5, kind: input, shape index: {}]   ;;  %s2808_s6 = inlined_call_operand.vmem [shape: f32[1,256], index: 6, kind: input, shape index: {}]   ;;  %s2809_s7 = inlined_call_operand.vmem [shape: f32[16,256], index: 7, kind: output, shape index: {}]  }
   0x1   :  { %13 = vsyncpa [#allocation5], 0  ;;  %s2466_s24 = smov [#allocation2]   ;;  %s2418_s28 = scalar_lea.hbm %s2803_s1, 12288 }
   0x2   :  { %s21_s25 = sshll.u32 %s2466_s24, 4  ;;  %p2419_p0 = scmp.ne.s32.totalorder %s2803_s1, %s2418_s28  ;;  %s22_s25 = int_to_ptr.vmem [resolvable:$true] %s21_s25 }
   0x3   :  { %p2422_p1 = scmp.lt.u32.totalorder %s2418_s28, %s2803_s1 }
   0x5   :  { %p2424_p2 = pnand %p2422_p1, %p2419_p0 }
   0x7   :  { %2427 = shalt.err (!%p2424_p2)
}
   0x8   :  { %s2428_s10 = scalar_lea.vmem %s22_s25, 12288  ;;  %p2433_p4 = scmp.lt.s32.totalorder %s22_s25, %s22_s25 }
   0x9   :  { %p2429_p3 = scmp.ne.s32.totalorder %s22_s25, %s2428_s10  ;;  %p2434_p5 = scmp.lt.s32.totalorder %s2428_s10, %s2428_s10 }
   0xb   :  { %p2435_p6 = por %p2434_p5, %p2433_p4 }
   0xd   :  { %p2436_p7 = pnand %p2435_p6, %p2429_p3 }
   0xf   :  { %2439 = shalt.err (!%p2436_p7)
}
  0x10   :  { %s2467_s11 = smov 128   ;;  %s2468_s12 = smov 8  }
  0x11   :  { %27 = dma.hbm_to_vmem [thread:$0]  %s2803_s1, 12288, %s22_s25, [#allocation3], %s2467_s11, %s2467_s11, %s2468_s12  }
  0x12   :  { %s2469_s15 = smov [#allocation4]   ;;  %s2440_s19 = scalar_lea.hbm %s2806_s4, 12288 }
  0x13   :  { %s37_s16 = sshll.u32 %s2469_s15, 4  ;;  %p2441_p8 = scmp.ne.s32.totalorder %s2806_s4, %s2440_s19  ;;  %s38_s16 = int_to_ptr.vmem [resolvable:$true] %s37_s16 }
  0x14   :  { %p2444_p9 = scmp.lt.u32.totalorder %s2440_s19, %s2806_s4 }
  0x16   :  { %p2446_p10 = pnand %p2444_p9, %p2441_p8 }
  0x18   :  { %2449 = shalt.err (!%p2446_p10)
}
  0x19   :  { %s2450_s24 = scalar_lea.vmem %s38_s16, 12288  ;;  %p2455_p12 = scmp.lt.s32.totalorder %s38_s16, %s38_s16 }
  0x1a   :  { %p2451_p11 = scmp.ne.s32.totalorder %s38_s16, %s2450_s24  ;;  %p2456_p13 = scmp.lt.s32.totalorder %s2450_s24, %s2450_s24 }
  0x1c   :  { %p2457_p0 = por %p2456_p13, %p2455_p12 }
  0x1e   :  { %p2458_p1 = pnand %p2457_p0, %p2451_p11 }
  0x20   :  { %2461 = shalt.err (!%p2458_p1)
}
  0x21   :  { %43 = dma.hbm_to_vmem [thread:$0]  %s2806_s4, 12288, %s38_s16, [#allocation5], %s2467_s11, %s2467_s11, %s2468_s12  }
  0x22   :  { %2462 = dma.done.wait [#allocation3], 12288  }
  0x23   :  { %2463 = vsyncadd [#allocation3], 4294955008 }
  0x24   :  { %2464 = dma.done.wait [#allocation5], 12288  }
  0x25   :  { %2465 = vsyncadd [#allocation5], 4294955008  ;;  %v2122_v0 = vld [vmem:[#allocation2 + $0x4] ss:$8 sps:$4 sm:$0xff]   ;;  %v2124_v1 = vld [vmem:[#allocation2] ss:$8 sps:$4 sm:$0xff]   ;;  %v58_v5 = vlaneseq }
  0x26   :  { %717 = vmatprep.subr.bf16.mxu0 %v2122_v0  ;;  %v2125_v2 = vld [vmem:[#allocation2 + $0x14] ss:$8 sps:$4 sm:$0xff]   ;;  %v2127_v3 = vld [vmem:[#allocation2 + $0x10] ss:$8 sps:$4 sm:$0xff]   ;;  %v2128_v4 = vld [vmem:[#allocation2 + $0x24] ss:$8 sps:$4 sm:$0xff]  }
  0x27   :  { %718 = vmatpush1.bf16.msra.mxu0 %v2124_v1  ;;  %v2130_v6 = vld [vmem:[#allocation2 + $0x20] ss:$8 sps:$4 sm:$0xff]   ;;  %v2131_v7 = vld [vmem:[#allocation2 + $0x34] ss:$8 sps:$4 sm:$0xff]   ;;  %v2538_v8 = vshrl.u32 %v58_v5, 7  ;;  %vm93_vm2 = vcmask 1040384  }
  0x28   :  { %719 = vmatprep.subr.bf16.mxu0 %v2125_v2  ;;  %v2133_v9 = vld [vmem:[#allocation2 + $0x30] ss:$8 sps:$4 sm:$0xff]   ;;  %v2134_v10 = vld [vmem:[#allocation2 + $0x44] ss:$8 sps:$4 sm:$0xff]   ;;  %v2136_v12 = vld [vmem:[#allocation2 + $0x40] ss:$8 sps:$4 sm:$0xff]  }
  0x29   :  { %v2541_v11 = vadd.s32 8, %v2538_v8  ;;  %v2137_v13 = vld [vmem:[#allocation2 + $0x54] ss:$8 sps:$4 sm:$0xff]   ;;  %v65_v14 = vand.u32 7, %v2538_v8  ;;  %v2139_v16 = vld [vmem:[#allocation2 + $0x50] ss:$8 sps:$4 sm:$0xff]  }
  0x2a   :  { %v2140_v17 = vld [vmem:[#allocation2 + $0x64] ss:$8 sps:$4 sm:$0xff]   ;;  %v2553_v19 = vld [vmem:[%s2802_s0 + $0x18] sm:$0xff]  ;;  %v2142_v22 = vld [vmem:[#allocation2 + $0x60] ss:$8 sps:$4 sm:$0xff]   ;;  %vm114_vm7 = vcmask 1046528  }
  0x2b   :  { %720 = vmatpush1.bf16.msra.mxu0 %v2127_v3  ;;  %v72_v15 = vand.u32 7, %v2541_v11  ;;  %v2548_v18 = vld [vmem:[%s2802_s0 + $0x8] sm:$0xff]  ;;  %vm85_vm0 = vcmp.ge.s32.totalorder %v65_v14, 1  ;;  %v98_v21 = vrot.slane %v2553_v19, 7  ;;  %v2143_v23 = vld [vmem:[#allocation2 + $0x74] ss:$8 sps:$4 sm:$0xff]  }
  0x2c   :  { %721 = vmatprep.subr.bf16.mxu0 %v2128_v4  ;;  %v95_v20 = vrot.slane %v2548_v18, 7  ;;  %v2145_v28 = vld [vmem:[#allocation2 + $0x70] ss:$8 sps:$4 sm:$0xff]   ;;  %v2146_v29 = vld [vmem:[#allocation2 + $0x84] ss:$8 sps:$4 sm:$0xff]   ;;  %v234_v54 = vpack.c.bf16 %v2553_v19, %v2548_v18  ;;  %vm87_vm4 = vcmp.lt.s32.totalorder %v65_v14, 7 }
  0x2d   :  { %vm86_vm1 = vcmp.ge.s32.totalorder %v72_v15, 1  ;;  %v2148_v30 = vld [vmem:[#allocation2 + $0x80] ss:$8 sps:$4 sm:$0xff]   ;;  %v2149_v31 = vld [vmem:[#allocation2 + $0x94] ss:$8 sps:$4 sm:$0xff]   ;;  %vm88_vm5 = vcmp.lt.s32.totalorder %v72_v15, 7 }
  0x2e   :  { %v99_v24 = vsel %vm93_vm2, %v95_v20, %v98_v21  ;;  %v105_v25 = vsel %vm93_vm2, 0.0, %v95_v20  ;;  %vm2563_vm3 = vmpackc.low %vm86_vm1, %vm85_vm0  ;;  %v2151_v32 = vld [vmem:[#allocation2 + $0x90] ss:$8 sps:$4 sm:$0xff]   ;;  %v2152_v33 = vld [vmem:[#allocation2 + $0xa4] ss:$8 sps:$4 sm:$0xff]   ;;  %s2470_s10 = smov 32  }
  0x2f   :  { %722 = vmatpush1.bf16.msra.mxu0 %v2130_v6  ;;  %v1980_v27 = vpack.c.bf16 %v99_v24, %v105_v25  ;;  %v2154_v34 = vld [vmem:[#allocation2 + $0xa0] ss:$8 sps:$4 sm:$0xff]   ;;  %v2155_v35 = vld [vmem:[#allocation2 + $0xb4] ss:$8 sps:$4 sm:$0xff]   ;;  %v2157_v36 = vld [vmem:[#allocation2 + $0xb0] ss:$8 sps:$4 sm:$0xff]  }
  0x30   :  { %723 = vmatprep.subr.bf16.mxu0 %v2131_v7  ;;  %v2158_v37 = vld [vmem:[#allocation2 + $0xc4] ss:$8 sps:$4 sm:$0xff]   ;;  %v2160_v38 = vld [vmem:[#allocation2 + $0xc0] ss:$8 sps:$4 sm:$0xff]   ;;  %v2161_v39 = vld [vmem:[#allocation2 + $0xd4] ss:$8 sps:$4 sm:$0xff]  }
  0x31   :  { %1981 = vmatprep.mubr.msk.bf16.mxu0 %vm2563_vm3, %v1980_v27  ;;  %v2163_v40 = vld [vmem:[#allocation2 + $0xd0] ss:$8 sps:$4 sm:$0xff]   ;;  %v2164_v41 = vld [vmem:[#allocation2 + $0xe4] ss:$8 sps:$4 sm:$0xff]   ;;  %v2166_v44 = vld [vmem:[#allocation2 + $0xe0] ss:$8 sps:$4 sm:$0xff]  }
  0x32   :  { %v2572_v42 = vld [vmem:[%s2802_s0] sm:$0xff]  ;;  %v2577_v43 = vld [vmem:[%s2802_s0 + $0x10] sm:$0xff]  ;;  %vm2589_vm6 = vmpackc.low %vm88_vm5, %vm87_vm4  ;;  %v118_v24 = vrot.slane %v2548_v18, 1  ;;  %v119_v27 = vrot.slane %v2553_v19, 1  ;;  %s2471_s11 = smov 64  }
  0x33   :  { %724 = vmatpush1.bf16.msra.mxu0 %v2133_v9  ;;  %v94_v45 = vrot.slane %v2572_v42, 7  ;;  %v96_v46 = vrot.slane %v2577_v43, 7  ;;  %v2167_v47 = vld [vmem:[#allocation2 + $0xf4] ss:$8 sps:$4 sm:$0xff]   ;;  %v2169_v48 = vld [vmem:[#allocation2 + $0xf0] ss:$8 sps:$4 sm:$0xff]  }
  0x34   :  { %725 = vmatprep.subr.bf16.mxu0 %v2134_v10  ;;  %v2172_v51 = vld [vmem:[#allocation2 + $0x104] ss:$8 sps:$4 sm:$0xff]   ;;  %v2170_v53 = vld [vmem:[#allocation2 + $0x100] ss:$8 sps:$4 sm:$0xff]   ;;  %v2175_v55 = vld [vmem:[#allocation2 + $0x114] ss:$8 sps:$4 sm:$0xff]  }
  0x35   :  { %v97_v49 = vsel %vm93_vm2, %v94_v45, %v96_v46  ;;  %v104_v50 = vsel %vm93_vm2, 0.0, %v94_v45  ;;  %v2173_v56 = vld [vmem:[#allocation2 + $0x110] ss:$8 sps:$4 sm:$0xff]   ;;  %v2178_v58 = vld [vmem:[#allocation2 + $0x124] ss:$8 sps:$4 sm:$0xff]  }
  0x36   :  { %v1983_v52 = vpack.c.bf16 %v97_v49, %v104_v50  ;;  %v2176_v59 = vld [vmem:[#allocation2 + $0x120] ss:$8 sps:$4 sm:$0xff]   ;;  %v2181_v60 = vld [vmem:[#allocation2 + $0x134] ss:$8 sps:$4 sm:$0xff]   ;;  %v2179_v61 = vld [vmem:[#allocation2 + $0x130] ss:$8 sps:$4 sm:$0xff]  }
  0x37   :  { %726 = vmatpush1.bf16.msra.mxu0 %v2136_v12  ;;  %v2184_v62 = vld [vmem:[#allocation2 + $0x144] ss:$8 sps:$4 sm:$0xff]   ;;  %v2182_v63 = vld [vmem:[#allocation2 + $0x140] ss:$8 sps:$4 sm:$0xff]   ;;  %v2187_v0 = vld [vmem:[#allocation2 + $0x154] ss:$8 sps:$4 sm:$0xff]  }
  0x38   :  { %727 = vmatprep.subr.bf16.mxu0 %v2137_v13  ;;  %v2185_v1 = vld [vmem:[#allocation2 + $0x150] ss:$8 sps:$4 sm:$0xff]   ;;  %v2190_v2 = vld [vmem:[#allocation2 + $0x164] ss:$8 sps:$4 sm:$0xff]   ;;  %v2188_v3 = vld [vmem:[#allocation2 + $0x160] ss:$8 sps:$4 sm:$0xff]  }
  0x39   :  { %v2193_v4 = vld [vmem:[#allocation2 + $0x174] ss:$8 sps:$4 sm:$0xff]   ;;  %v2191_v6 = vld [vmem:[#allocation2 + $0x170] ss:$8 sps:$4 sm:$0xff]   ;;  %v2196_v7 = vld [vmem:[#allocation2 + $0x184] ss:$8 sps:$4 sm:$0xff]  }
  0x3a   :  { %v2194_v9 = vld [vmem:[#allocation2 + $0x180] ss:$8 sps:$4 sm:$0xff]   ;;  %v2199_v10 = vld [vmem:[#allocation2 + $0x194] ss:$8 sps:$4 sm:$0xff]   ;;  %v2197_v11 = vld [vmem:[#allocation2 + $0x190] ss:$8 sps:$4 sm:$0xff]  }
  0x3b   :  { %728 = vmatpush1.bf16.msra.mxu0 %v2139_v16  ;;  %v2202_v12 = vld [vmem:[#allocation2 + $0x1a4] ss:$8 sps:$4 sm:$0xff]   ;;  %v2200_v13 = vld [vmem:[#allocation2 + $0x1a0] ss:$8 sps:$4 sm:$0xff]   ;;  %v2205_v14 = vld [vmem:[#allocation2 + $0x1b4] ss:$8 sps:$4 sm:$0xff]  }
  0x3c   :  { %729 = vmatprep.subr.bf16.mxu0 %v2140_v17  ;;  %v2203_v15 = vld [vmem:[#allocation2 + $0x1b0] ss:$8 sps:$4 sm:$0xff]   ;;  %v2208_v16 = vld [vmem:[#allocation2 + $0x1c4] ss:$8 sps:$4 sm:$0xff]   ;;  %v2206_v17 = vld [vmem:[#allocation2 + $0x1c0] ss:$8 sps:$4 sm:$0xff]  }
  0x3d   :  { %v2211_v20 = vld [vmem:[#allocation2 + $0x1d4] ss:$8 sps:$4 sm:$0xff]   ;;  %v2209_v21 = vld [vmem:[#allocation2 + $0x1d0] ss:$8 sps:$4 sm:$0xff]   ;;  %v2238_v45 = vld [vmem:[#allocation2 + $0x264] ss:$8 sps:$4 sm:$0xff]  }
  0x3e   :  { %v2217_v25 = vld [vmem:[#allocation2 + $0x1f4] ss:$8 sps:$4 sm:$0xff]   ;;  %v2221_v19 = vld [vmem:[#allocation2 + $0x210] ss:$8 sps:$4 sm:$0xff]   ;;  %v2236_v46 = vld [vmem:[#allocation2 + $0x260] ss:$8 sps:$4 sm:$0xff]  }
  0x3f   :  { %730 = vmatpush1.bf16.msra.mxu0 %v2142_v22  ;;  %v2214_v22 = vld [vmem:[#allocation2 + $0x1e4] ss:$8 sps:$4 sm:$0xff]   ;;  %v2223_v18 = vld [vmem:[#allocation2 + $0x214] ss:$8 sps:$4 sm:$0xff]   ;;  %v2242_v50 = vld [vmem:[#allocation2 + $0x280] ss:$8 sps:$4 sm:$0xff]  }
  0x40   :  { %731 = vmatprep.subr.bf16.mxu0 %v2143_v23  ;;  %v2212_v23 = vld [vmem:[#allocation2 + $0x1e0] ss:$8 sps:$4 sm:$0xff]   ;;  %v2244_v49 = vld [vmem:[#allocation2 + $0x284] ss:$8 sps:$4 sm:$0xff]   ;;  %v2323_v26 = vld [vmem:[#allocation4 + $0x130] ss:$8 sps:$4 sm:$0xff]  }
  0x43   :  { %732 = vmatpush1.bf16.msra.mxu0 %v2145_v28  ;;  %v2215_v28 = vld [vmem:[#allocation2 + $0x1f0] ss:$8 sps:$4 sm:$0xff]  }
  0x44   :  { %733 = vmatprep.subr.bf16.mxu0 %v2146_v29  ;;  %v2220_v29 = vld [vmem:[#allocation2 + $0x204] ss:$8 sps:$4 sm:$0xff]  }
  0x47   :  { %734 = vmatpush1.bf16.msra.mxu0 %v2148_v30  ;;  %v120_v30 = vsel %vm114_vm7, %v118_v24, %v119_v27 }
  0x48   :  { %735 = vmatprep.subr.bf16.mxu0 %v2149_v31  ;;  %v126_v31 = vsel %vm114_vm7, %v119_v27, 0.0 }
  0x4b   :  { %736 = vmatpush1.bf16.msra.mxu0 %v2151_v32  ;;  %v233_v32 = vpack.c.bf16 %v2577_v43, %v2572_v42 }
  0x4c   :  { %737 = vmatprep.subr.bf16.mxu0 %v2152_v33  ;;  %v2218_v33 = vld [vmem:[#allocation2 + $0x200] ss:$8 sps:$4 sm:$0xff]  }
  0x4f   :  { %738 = vmatpush1.bf16.msra.mxu0 %v2154_v34  ;;  %v1986_v34 = vpack.c.bf16 %v126_v31, %v120_v30 }
  0x50   :  { %739 = vmatprep.subr.bf16.mxu0 %v2155_v35  ;;  %v2226_v35 = vld [vmem:[#allocation2 + $0x224] ss:$8 sps:$4 sm:$0xff]  }
  0x53   :  { %740 = vmatpush1.bf16.msra.mxu0 %v2157_v36  ;;  %v2224_v36 = vld [vmem:[#allocation2 + $0x220] ss:$8 sps:$4 sm:$0xff]  }
  0x54   :  { %741 = vmatprep.subr.bf16.mxu0 %v2158_v37  ;;  %v2229_v37 = vld [vmem:[#allocation2 + $0x234] ss:$8 sps:$4 sm:$0xff]  }
  0x57   :  { %742 = vmatpush1.bf16.msra.mxu0 %v2160_v38  ;;  %v2227_v38 = vld [vmem:[#allocation2 + $0x230] ss:$8 sps:$4 sm:$0xff]  }
  0x58   :  { %743 = vmatprep.subr.bf16.mxu0 %v2161_v39  ;;  %v2232_v39 = vld [vmem:[#allocation2 + $0x244] ss:$8 sps:$4 sm:$0xff]  }
  0x5b   :  { %744 = vmatpush1.bf16.msra.mxu0 %v2163_v40  ;;  %v2230_v40 = vld [vmem:[#allocation2 + $0x240] ss:$8 sps:$4 sm:$0xff]  }
  0x5c   :  { %745 = vmatprep.subr.bf16.mxu0 %v2164_v41  ;;  %v2235_v41 = vld [vmem:[#allocation2 + $0x254] ss:$8 sps:$4 sm:$0xff]  }
  0x5f   :  { %746 = vmatpush1.bf16.msra.mxu0 %v2166_v44  ;;  %v2233_v44 = vld [vmem:[#allocation2 + $0x250] ss:$8 sps:$4 sm:$0xff]  }
  0x60   :  { %747 = vmatprep.subr.bf16.mxu0 %v2167_v47  ;;  %v2241_v47 = vld [vmem:[#allocation2 + $0x274] ss:$8 sps:$4 sm:$0xff]  }
  0x63   :  { %748 = vmatpush1.bf16.msra.mxu0 %v2169_v48  ;;  %v2239_v48 = vld [vmem:[#allocation2 + $0x270] ss:$8 sps:$4 sm:$0xff]  }
  0x64   :  { %760 = vmatprep.subr.bf16.mxu0 %v2172_v51  ;;  %v2247_v51 = vld [vmem:[#allocation2 + $0x294] ss:$8 sps:$4 sm:$0xff]  }
  0x66   :  { %1984 = vmatmul.mubr.msk.bf16.vlgmr.msra.gmra.mrb[0].mxu0 %vm2563_vm3, %v1983_v52  ;;  %v2245_v52 = vld [vmem:[#allocation2 + $0x290] ss:$8 sps:$4 sm:$0xff]  }
  0x67   :  { %761 = vmatpush1.bf16.msra.mxu0 %v2170_v53  ;;  %792 = vmatprep.mubr.bf16.mxu0 %v234_v54  ;;  %v2250_v53 = vld [vmem:[#allocation2 + $0x2a4] ss:$8 sps:$4 sm:$0xff]   ;;  %v2248_v54 = vld [vmem:[#allocation2 + $0x2a0] ss:$8 sps:$4 sm:$0xff]  }
  0x68   :  { %762 = vmatprep.subr.bf16.mxu0 %v2175_v55  ;;  %v2253_v55 = vld [vmem:[#allocation2 + $0x2b4] ss:$8 sps:$4 sm:$0xff]  }
  0x6b   :  { %763 = vmatpush1.bf16.msra.mxu0 %v2173_v56  ;;  %v2251_v56 = vld [vmem:[#allocation2 + $0x2b0] ss:$8 sps:$4 sm:$0xff]  }
  0x6c   :  { %764 = vmatprep.subr.bf16.mxu0 %v2178_v58  ;;  %v2256_v58 = vld [vmem:[#allocation2 + $0x2c4] ss:$8 sps:$4 sm:$0xff]  }
  0x6f   :  { %765 = vmatpush1.bf16.msra.mxu0 %v2176_v59  ;;  %v2254_v59 = vld [vmem:[#allocation2 + $0x2c0] ss:$8 sps:$4 sm:$0xff]  }
  0x70   :  { %766 = vmatprep.subr.bf16.mxu0 %v2181_v60  ;;  %v2259_v60 = vld [vmem:[#allocation2 + $0x2d4] ss:$8 sps:$4 sm:$0xff]  }
  0x73   :  { %767 = vmatpush1.bf16.msra.mxu0 %v2179_v61  ;;  %v2257_v61 = vld [vmem:[#allocation2 + $0x2d0] ss:$8 sps:$4 sm:$0xff]  }
  0x74   :  { %768 = vmatprep.subr.bf16.mxu0 %v2184_v62  ;;  %v2262_v62 = vld [vmem:[#allocation2 + $0x2e4] ss:$8 sps:$4 sm:$0xff]  }
  0x77   :  { %769 = vmatpush1.bf16.msra.mxu0 %v2182_v63  ;;  %v2260_v63 = vld [vmem:[#allocation2 + $0x2e0] ss:$8 sps:$4 sm:$0xff]  }
  0x78   :  { %770 = vmatprep.subr.bf16.mxu0 %v2187_v0  ;;  %v115_v0 = vrot.slane %v2572_v42, 1 }
  0x7b   :  { %771 = vmatpush1.bf16.msra.mxu0 %v2185_v1  ;;  %v116_v1 = vrot.slane %v2577_v43, 1 }
  0x7c   :  { %772 = vmatprep.subr.bf16.mxu0 %v2190_v2  ;;  %v2265_v2 = vld [vmem:[#allocation2 + $0x2f4] ss:$8 sps:$4 sm:$0xff]  }
  0x7f   :  { %773 = vmatpush1.bf16.msra.mxu0 %v2188_v3  ;;  %v2263_v3 = vld [vmem:[#allocation2 + $0x2f0] ss:$8 sps:$4 sm:$0xff]  }
  0x80   :  { %774 = vmatprep.subr.bf16.mxu0 %v2193_v4  ;;  %v117_v4 = vsel %vm114_vm7, %v115_v0, %v116_v1  ;;  %v2280_v0 = vld [vmem:[#allocation4 + $0x40] ss:$8 sps:$4 sm:$0xff]  }
  0x83   :  { %775 = vmatpush1.bf16.msra.mxu0 %v2191_v6  ;;  %v125_v6 = vsel %vm114_vm7, %v116_v1, 0.0  ;;  %v2281_v1 = vld [vmem:[#allocation4 + $0x54] ss:$8 sps:$4 sm:$0xff]  }
  0x84   :  { %776 = vmatprep.subr.bf16.mxu0 %v2196_v7  ;;  %v1989_v7 = vpack.c.bf16 %v125_v6, %v117_v4  ;;  %v2286_v4 = vld [vmem:[#allocation4 + $0x60] ss:$8 sps:$4 sm:$0xff]   ;;  %v2287_v6 = vld [vmem:[#allocation4 + $0x74] ss:$8 sps:$4 sm:$0xff]  }
  0x87   :  { %777 = vmatpush1.bf16.msra.mxu0 %v2194_v9 }
  0x88   :  { %778 = vmatprep.subr.bf16.mxu0 %v2199_v10 }
  0x8b   :  { %779 = vmatpush1.bf16.msra.mxu0 %v2197_v11 }
  0x8c   :  { %780 = vmatprep.subr.bf16.mxu0 %v2202_v12 }
  0x8f   :  { %781 = vmatpush1.bf16.msra.mxu0 %v2200_v13 }
  0x90   :  { %782 = vmatprep.subr.bf16.mxu0 %v2205_v14 }
  0x93   :  { %783 = vmatpush1.bf16.msra.mxu0 %v2203_v15 }
  0x94   :  { %784 = vmatprep.subr.bf16.mxu0 %v2208_v16 }
  0x97   :  { %785 = vmatpush1.bf16.msra.mxu0 %v2206_v17 }
  0x98   :  { %786 = vmatprep.subr.bf16.mxu0 %v2211_v20 }
  0x9b   :  { %787 = vmatpush1.bf16.msra.mxu0 %v2209_v21 }
  0x9c   :  { %788 = vmatprep.subr.bf16.mxu0 %v2214_v22 }
  0x9f   :  { %789 = vmatpush1.bf16.msra.mxu0 %v2212_v23 }
  0xa0   :  { %790 = vmatprep.subr.bf16.mxu0 %v2217_v25 }
  0xa3   :  { %791 = vmatpush1.bf16.msra.mxu0 %v2215_v28 }
  0xa4   :  { %803 = vmatprep.subr.bf16.mxu0 %v2220_v29 }
  0xa6   :  { %793 = vmatmul.mubr.bf16.vlgmr.msra.gmra.mrb[0].mxu0 %v233_v32 }
  0xa7   :  { %804 = vmatpush1.bf16.msra.mxu0 %v2218_v33  ;;  %1987 = vmatprep.mubr.msk.bf16.mxu0 %vm2589_vm6, %v1986_v34 }
  0xa8   :  { %805 = vmatprep.subr.bf16.mxu0 %v2223_v18 }
  0xab   :  { %806 = vmatpush1.bf16.msra.mxu0 %v2221_v19 }
  0xac   :  { %807 = vmatprep.subr.bf16.mxu0 %v2226_v35 }
  0xaf   :  { %808 = vmatpush1.bf16.msra.mxu0 %v2224_v36 }
  0xb0   :  { %809 = vmatprep.subr.bf16.mxu0 %v2229_v37 }
  0xb3   :  { %810 = vmatpush1.bf16.msra.mxu0 %v2227_v38 }
  0xb4   :  { %811 = vmatprep.subr.bf16.mxu0 %v2232_v39 }
  0xb7   :  { %812 = vmatpush1.bf16.msra.mxu0 %v2230_v40 }
  0xb8   :  { %813 = vmatprep.subr.bf16.mxu0 %v2235_v41 }
  0xbb   :  { %814 = vmatpush1.bf16.msra.mxu0 %v2233_v44 }
  0xbc   :  { %815 = vmatprep.subr.bf16.mxu0 %v2238_v45 }
  0xbf   :  { %816 = vmatpush1.bf16.msra.mxu0 %v2236_v46 }
  0xc0   :  { %817 = vmatprep.subr.bf16.mxu0 %v2241_v47 }
  0xc3   :  { %818 = vmatpush1.bf16.msra.mxu0 %v2239_v48  ;;  %v2266_v48 = vld [vmem:[#allocation4 + $0x4] ss:$8 sps:$4 sm:$0xff]  }
  0xc4   :  { %819 = vmatprep.subr.bf16.mxu0 %v2244_v49  ;;  %v2268_v49 = vld [vmem:[#allocation4] ss:$8 sps:$4 sm:$0xff]   ;;  %1604 = vmatprep.subr.bf16.mxu1 %v2266_v48 }
  0xc5   :  { %1605 = vmatpush1.bf16.msra.mxu1 %v2268_v49 }
  0xc7   :  { %820 = vmatpush1.bf16.msra.mxu0 %v2242_v50  ;;  %v2634_v50 = vand.u32 127, %v58_v5 }
  0xc8   :  { %821 = vmatprep.subr.bf16.mxu0 %v2247_v51  ;;  %v2269_v51 = vld [vmem:[#allocation4 + $0x14] ss:$8 sps:$4 sm:$0xff]  }
  0xc9   :  { %1606 = vmatprep.subr.bf16.mxu1 %v2269_v51  ;;  %vm888_vm8 = vcmp.lt.s32.totalorder %v2634_v50, 32  ;;  %vm897_vm9 = vcmp.lt.s32.totalorder %v2634_v50, 64  ;;  %v1733_v50 = vld [vmem:[%s2807_s5] sm:$0x3] }
  0xcb   :  { %822 = vmatpush1.bf16.msra.mxu0 %v2245_v52  ;;  %v2271_v52 = vld [vmem:[#allocation4 + $0x10] ss:$8 sps:$4 sm:$0xff]  }
  0xcc   :  { %823 = vmatprep.subr.bf16.mxu0 %v2250_v53  ;;  %1607 = vmatpush1.bf16.msra.mxu1 %v2271_v52 }
  0xcf   :  { %824 = vmatpush1.bf16.msra.mxu0 %v2248_v54  ;;  %v2272_v54 = vld [vmem:[#allocation4 + $0x24] ss:$8 sps:$4 sm:$0xff]  }
  0xd0   :  { %825 = vmatprep.subr.bf16.mxu0 %v2253_v55  ;;  %v2274_v55 = vld [vmem:[#allocation4 + $0x20] ss:$8 sps:$4 sm:$0xff]   ;;  %1608 = vmatprep.subr.bf16.mxu1 %v2272_v54  ;;  %v2660_v54 = vsub.s32 0, %v2538_v8 }
  0xd1   :  { %1609 = vmatpush1.bf16.msra.mxu1 %v2274_v55  ;;  %v2663_v55 = vsub.s32 1, %v2538_v8 }
  0xd3   :  { %826 = vmatpush1.bf16.msra.mxu0 %v2251_v56 }
  0xd4   :  { %827 = vmatprep.subr.bf16.mxu0 %v2256_v58 }
  0xd7   :  { %828 = vmatpush1.bf16.msra.mxu0 %v2254_v59 }
  0xd8   :  { %829 = vmatprep.subr.bf16.mxu0 %v2259_v60  ;;  %v2275_v60 = vld [vmem:[#allocation4 + $0x34] ss:$8 sps:$4 sm:$0xff]  }
  0xd9   :  { %1610 = vmatprep.subr.bf16.mxu1 %v2275_v60 }
  0xdb   :  { %830 = vmatpush1.bf16.msra.mxu0 %v2257_v61  ;;  %v2277_v61 = vld [vmem:[#allocation4 + $0x30] ss:$8 sps:$4 sm:$0xff]  }
  0xdc   :  { %831 = vmatprep.subr.bf16.mxu0 %v2262_v62  ;;  %1611 = vmatpush1.bf16.msra.mxu1 %v2277_v61 }
  0xdf   :  { %832 = vmatpush1.bf16.msra.mxu0 %v2260_v63  ;;  %v2278_v63 = vld [vmem:[#allocation4 + $0x44] ss:$8 sps:$4 sm:$0xff]  }
  0xe0   :  { %833 = vmatprep.subr.bf16.mxu0 %v2265_v2  ;;  %1612 = vmatprep.subr.bf16.mxu1 %v2278_v63  ;;  %v2283_v2 = vld [vmem:[#allocation4 + $0x50] ss:$8 sps:$4 sm:$0xff]  }
  0xe1   :  { %1613 = vmatpush1.bf16.msra.mxu1 %v2280_v0  ;;  %v847_v0 = vld [vmem:[%s2805_s3] sm:$0x3] }
  0xe2   :  { %1614 = vmatprep.subr.bf16.mxu1 %v2281_v1 }
  0xe3   :  { %834 = vmatpush1.bf16.msra.mxu0 %v2263_v3  ;;  %v2284_v3 = vld [vmem:[#allocation4 + $0x64] ss:$8 sps:$4 sm:$0xff]  }
  0xe5   :  { %1615 = vmatpush1.bf16.msra.mxu1 %v2283_v2 }
  0xe6   :  { %1990 = vmatmul.mubr.msk.bf16.vlgmr.msra.gmra.mrb[0].mxu0 %vm2589_vm6, %v1989_v7  ;;  %1616 = vmatprep.subr.bf16.mxu1 %v2284_v3  ;;  %v2289_v7 = vld [vmem:[#allocation4 + $0x70] ss:$8 sps:$4 sm:$0xff]  }
  0xe9   :  { %1617 = vmatpush1.bf16.msra.mxu1 %v2286_v4 }
  0xea   :  { %1618 = vmatprep.subr.bf16.mxu1 %v2287_v6 }
  0xed   :  { %1619 = vmatpush1.bf16.msra.mxu1 %v2289_v7 }
 0x1b9   :  { %v2609_v9 = vpop.f32.mrb[0].mxu0 }
 0x1ba   :  { %v2611_v10 = vpop.f32.mrb[1].mxu0  ;;  %v862_v43 = vmul.f32 %v2609_v9, %v2609_v9 }
 0x1bb   :  { %v2613_v42 = vpop.f32.mrb[2].mxu0  ;;  %v863_v14 = vmul.f32 %v2611_v10, %v2611_v10 }
 0x1bc   :  { %v848_v11 = vadd.f32 %v2613_v42, %v2609_v9  ;;  %v864_v12 = vmul.f32 %v2613_v42, %v2613_v42  ;;  %v2621_v13 = vpop.f32.mrb[3].mxu0 }
 0x1bd   :  { %v855_v15 = vadd.f32 %v2621_v13, %v2611_v10  ;;  %v865_v16 = vmul.f32 %v2621_v13, %v2621_v13 }
 0x1be   :  { %v849_v17 = vrot.slane %v848_v11, 4  ;;  %v866_v20 = vadd.f32 %v864_v12, %v862_v43  ;;  %v2290_v43 = vld [vmem:[#allocation4 + $0x84] ss:$8 sps:$4 sm:$0xff]   ;;  %v2293_v12 = vld [vmem:[#allocation4 + $0x94] ss:$8 sps:$4 sm:$0xff]  }
 0x1bf   :  { %v856_v21 = vrot.slane %v855_v15, 4  ;;  %v873_v22 = vadd.f32 %v865_v16, %v863_v14  ;;  %1620 = vmatprep.subr.bf16.mxu1 %v2290_v43  ;;  %v2295_v14 = vld [vmem:[#allocation4 + $0x90] ss:$8 sps:$4 sm:$0xff]   ;;  %v2298_v16 = vld [vmem:[#allocation4 + $0xa0] ss:$8 sps:$4 sm:$0xff]  }
 0x1c0   :  { %v850_v23 = vadd.f32 %v849_v17, %v848_v11  ;;  %v867_v24 = vrot.slane %v866_v20, 4  ;;  %v2292_v11 = vld [vmem:[#allocation4 + $0x80] ss:$8 sps:$4 sm:$0xff]   ;;  %v2299_v17 = vld [vmem:[#allocation4 + $0xb4] ss:$8 sps:$4 sm:$0xff]  }
 0x1c1   :  { %v857_v25 = vadd.f32 %v856_v21, %v855_v15  ;;  %v874_v27 = vrot.slane %v873_v22, 4  ;;  %1621 = vmatpush1.bf16.msra.mxu1 %v2292_v11  ;;  %v2296_v15 = vld [vmem:[#allocation4 + $0xa4] ss:$8 sps:$4 sm:$0xff]  }
 0x1c2   :  { %v851_v28 = vrot.slane %v850_v23, 2  ;;  %v868_v29 = vadd.f32 %v867_v24, %v866_v20  ;;  %1622 = vmatprep.subr.bf16.mxu1 %v2293_v12  ;;  %v2301_v20 = vld [vmem:[#allocation4 + $0xb0] ss:$8 sps:$4 sm:$0xff]   ;;  %v2302_v21 = vld [vmem:[#allocation4 + $0xc4] ss:$8 sps:$4 sm:$0xff]  }
 0x1c3   :  { %v858_v30 = vrot.slane %v857_v25, 2  ;;  %v875_v31 = vadd.f32 %v874_v27, %v873_v22  ;;  %v2304_v22 = vld [vmem:[#allocation4 + $0xc0] ss:$8 sps:$4 sm:$0xff]   ;;  %v2307_v24 = vld [vmem:[#allocation4 + $0xd0] ss:$8 sps:$4 sm:$0xff]  }
 0x1c4   :  { %v852_v32 = vadd.f32 %v851_v28, %v850_v23  ;;  %v869_v33 = vrot.slane %v868_v29, 2  ;;  %v2305_v23 = vld [vmem:[#allocation4 + $0xd4] ss:$8 sps:$4 sm:$0xff]   ;;  %v2310_v27 = vld [vmem:[#allocation4 + $0xe0] ss:$8 sps:$4 sm:$0xff]  }
 0x1c5   :  { %v859_v34 = vadd.f32 %v858_v30, %v857_v25  ;;  %v876_v18 = vrot.slane %v875_v31, 2  ;;  %1623 = vmatpush1.bf16.msra.mxu1 %v2295_v14  ;;  %v2308_v25 = vld [vmem:[#allocation4 + $0xe4] ss:$8 sps:$4 sm:$0xff]   ;;  %v2311_v28 = vld [vmem:[#allocation4 + $0xf4] ss:$8 sps:$4 sm:$0xff]  }
 0x1c6   :  { %v853_v19 = vrot.slane %v852_v32, 1  ;;  %v870_v35 = vadd.f32 %v869_v33, %v868_v29  ;;  %1624 = vmatprep.subr.bf16.mxu1 %v2296_v15  ;;  %v2313_v29 = vld [vmem:[#allocation4 + $0xf0] ss:$8 sps:$4 sm:$0xff]   ;;  %v2316_v30 = vld [vmem:[#allocation4 + $0x104] ss:$8 sps:$4 sm:$0xff]  }
 0x1c7   :  { %v860_v36 = vrot.slane %v859_v34, 1  ;;  %v877_v37 = vadd.f32 %v876_v18, %v875_v31 }
 0x1c8   :  { %v871_v38 = vrot.slane %v870_v35, 1  ;;  %v854_v40 = vadd.f32 %v853_v19, %v852_v32 }
 0x1c9   :  { %v878_v39 = vrot.slane %v877_v37, 1  ;;  %v861_v44 = vadd.f32 %v860_v36, %v859_v34  ;;  %1625 = vmatpush1.bf16.msra.mxu1 %v2298_v16 }
 0x1ca   :  { %v872_v41 = vadd.f32 %v871_v38, %v870_v35  ;;  %1626 = vmatprep.subr.bf16.mxu1 %v2299_v17 }
 0x1cb   :  { %v879_v45 = vadd.f32 %v878_v39, %v877_v37 }
 0x1cc   :  { %v880_v46 = vsel %vm93_vm2, %v854_v40, %v872_v41 }
 0x1cd   :  { %882 = vrot.lane.b32.xlu0 %v880_v46, %s2470_s10  ;;  %v881_v47 = vsel %vm93_vm2, %v861_v44, %v879_v45  ;;  %1627 = vmatpush1.bf16.msra.mxu1 %v2301_v20  ;;  %v2472_v44 = vmov 1966171168  }
 0x1ce   :  { %1628 = vmatprep.subr.bf16.mxu1 %v2302_v21  ;;  %v915_v45 = vunpack.c.l.s4 %v2472_v44  ;;  %v2322_v44 = vld [vmem:[#allocation4 + $0x124] ss:$8 sps:$4 sm:$0xff]  }
 0x1d1   :  { %884 = vrot.lane.b32.xlu0 %v881_v47, %s2470_s10  ;;  %1629 = vmatpush1.bf16.msra.mxu1 %v2304_v22 }
 0x1d2   :  { %1630 = vmatprep.subr.bf16.mxu1 %v2305_v23 }
 0x1d5   :  { %1631 = vmatpush1.bf16.msra.mxu1 %v2307_v24 }
 0x1d6   :  { %1632 = vmatprep.subr.bf16.mxu1 %v2308_v25 }
 0x1d9   :  { %1633 = vmatpush1.bf16.msra.mxu1 %v2310_v27 }
 0x1da   :  { %1634 = vmatprep.subr.bf16.mxu1 %v2311_v28 }
 0x1dd   :  { %1635 = vmatpush1.bf16.msra.mxu1 %v2313_v29 }
 0x1de   :  { %1647 = vmatprep.subr.bf16.mxu1 %v2316_v30 }
 0x23f   :  { %v883_v53 = vpop.permute.xlu0 %882 }
 0x243   :  { %v885_v56 = vpop.permute.xlu0 %884 }
 0x244   :  { %v890_v58 = vsel %vm888_vm8, %v885_v56, %v883_v53  ;;  %v889_v5 = vsel %vm888_vm8, %v883_v53, %v885_v56  ;;  %v846_v53 = vld [vmem:[%s2804_s2] sm:$0x3] }
 0x245   :  { %v2639_v59 = vadd.f32 %v890_v58, %v880_v46  ;;  %v892_v62 = vadd.f32 %v889_v5, %v881_v47  ;;  %v916_v46 = vunpack.c.0.s8 %v915_v45  ;;  %v2320_v45 = vld [vmem:[#allocation4 + $0x120] ss:$8 sps:$4 sm:$0xff]  }
 0x247   :  { %893 = vrot.lane.b32.xlu1 %v2639_v59, %s2471_s11  ;;  %v2653_v47 = vsub.s32 %v916_v46, %v2538_v8  ;;  %v2325_v46 = vld [vmem:[#allocation4 + $0x134] ss:$8 sps:$4 sm:$0xff]  }
 0x24b   :  { %895 = vrot.lane.b32.xlu1 %v892_v62, %s2471_s11 }
 0x2b9   :  { %v894_v31 = vpop.permute.xlu1 %893 }
 0x2bd   :  { %v896_v32 = vpop.permute.xlu1 %895 }
 0x2be   :  { %v898_v33 = vsel %vm897_vm9, %v894_v31, %v896_v32  ;;  %v899_v34 = vsel %vm897_vm9, %v896_v32, %v894_v31  ;;  %v2314_v32 = vld [vmem:[#allocation4 + $0x100] ss:$8 sps:$4 sm:$0xff]  }
 0x2bf   :  { %v900_v18 = vadd.f32 %v899_v34, %v2639_v59  ;;  %v901_v19 = vadd.f32 %v898_v33, %v892_v62 }
 0x2c1   :  { %v902_v35 = vadd.f32 %v901_v19, %v900_v18  ;;  %v2319_v19 = vld [vmem:[#allocation4 + $0x114] ss:$8 sps:$4 sm:$0xff]  }
 0x2c3   :  { %v903_v36 = vmul.f32 0.0078125, %v902_v35 }
 0x2c5   :  { %v904_v37 = vmul.f32 %v903_v36, %v903_v36 }
 0x2c7   :  { %v906_v38 = vrot.slane %v904_v37, 7 }
 0x2c9   :  { %v908_v39 = vsub.f32 %v903_v36, %v906_v38 }
 0x2cb   :  { %v909_v40 = vmax.f32 %v908_v39, 0.0 }
 0x2cd   :  { %v910_v41 = vadd.f32 1e-05, %v909_v40  ;;  %v2317_v40 = vld [vmem:[#allocation4 + $0x110] ss:$8 sps:$4 sm:$0xff]  }
 0x2cf   :  { %2410 = vrsqrt.f32 %v910_v41 }
 0x2d9   :  { %v2411_v48 = vpop.eup %2410 }
 0x2da   :  { %v913_v49 = vcombine.low %v2411_v48, %v2411_v48  ;;  %v2328_v48 = vld [vmem:[#allocation4 + $0x144] ss:$8 sps:$4 sm:$0xff]  }
 0x2dc   :  { %v920_v51 = vrot.slane %v913_v49, %v2653_v47  ;;  %v2326_v49 = vld [vmem:[#allocation4 + $0x140] ss:$8 sps:$4 sm:$0xff]  }
 0x2de   :  { %v921_v52 = vcombine.high %v920_v51, %v920_v51  ;;  %v2331_v51 = vld [vmem:[#allocation4 + $0x154] ss:$8 sps:$4 sm:$0xff]  }
 0x2e0   :  { %v928_v56 = vrot.slane %v921_v52, %v2653_v47  ;;  %v2329_v52 = vld [vmem:[#allocation4 + $0x150] ss:$8 sps:$4 sm:$0xff]  }
 0x2e2   :  { %v930_v58 = vmul.f32 %v928_v56, %v846_v53  ;;  %v2334_v53 = vld [vmem:[#allocation4 + $0x164] ss:$8 sps:$4 sm:$0xff]   ;;  %v2332_v56 = vld [vmem:[#allocation4 + $0x160] ss:$8 sps:$4 sm:$0xff]  }
 0x2e4   :  { %v935_v59 = vrot.slane %v930_v58, %v2660_v54  ;;  %v939_v60 = vrot.slane %v930_v58, %v2663_v55  ;;  %v2337_v58 = vld [vmem:[#allocation4 + $0x174] ss:$8 sps:$4 sm:$0xff]  }
 0x2e6   :  { %v942_v5 = vmul.f32 %v935_v59, %v903_v36  ;;  %v943_v61 = vmul.f32 %v939_v60, %v903_v36  ;;  %v964_v2 = vmul.f32 %v939_v60, %v2611_v10  ;;  %v965_v3 = vmul.f32 %v935_v59, %v2613_v42 }
 0x2e7   :  { %v966_v4 = vmul.f32 %v939_v60, %v2621_v13  ;;  %v963_v43 = vmul.f32 %v935_v59, %v2609_v9  ;;  %v2335_v59 = vld [vmem:[#allocation4 + $0x170] ss:$8 sps:$4 sm:$0xff]   ;;  %v2340_v60 = vld [vmem:[#allocation4 + $0x184] ss:$8 sps:$4 sm:$0xff]  }
 0x2e8   :  { %v946_v62 = vcombine.low %v942_v5, %v943_v61  ;;  %v2338_v5 = vld [vmem:[#allocation4 + $0x180] ss:$8 sps:$4 sm:$0xff]   ;;  %v2343_v61 = vld [vmem:[#allocation4 + $0x194] ss:$8 sps:$4 sm:$0xff]  }
 0x2ea   :  { %v953_v63 = vrot.slane %v946_v62, %v2653_v47  ;;  %v2341_v62 = vld [vmem:[#allocation4 + $0x190] ss:$8 sps:$4 sm:$0xff]  }
 0x2ec   :  { %v960_v1 = vrot.slane %v953_v63, %v2653_v47  ;;  %v2346_v63 = vld [vmem:[#allocation4 + $0x1a4] ss:$8 sps:$4 sm:$0xff]  }
 0x2ee   :  { %v962_v8 = vsub.f32 %v847_v0, %v960_v1  ;;  %v2344_v0 = vld [vmem:[#allocation4 + $0x1a0] ss:$8 sps:$4 sm:$0xff]   ;;  %v2349_v1 = vld [vmem:[#allocation4 + $0x1b4] ss:$8 sps:$4 sm:$0xff]  }
 0x2f0   :  { %v971_v6 = vrot.slane %v962_v8, %v2660_v54  ;;  %v975_v7 = vrot.slane %v962_v8, %v2663_v55  ;;  %v2347_v8 = vld [vmem:[#allocation4 + $0x1b0] ss:$8 sps:$4 sm:$0xff]  }
 0x2f2   :  { %v979_v11 = vadd.f32 %v975_v7, %v964_v2  ;;  %v980_v12 = vadd.f32 %v971_v6, %v965_v3  ;;  %v981_v14 = vadd.f32 %v975_v7, %v966_v4  ;;  %v978_v15 = vadd.f32 %v971_v6, %v963_v43  ;;  %v2352_v2 = vld [vmem:[#allocation4 + $0x1c4] ss:$8 sps:$4 sm:$0xff]   ;;  %v2350_v3 = vld [vmem:[#allocation4 + $0x1c0] ss:$8 sps:$4 sm:$0xff]   ;;  %v2355_v4 = vld [vmem:[#allocation4 + $0x1d4] ss:$8 sps:$4 sm:$0xff]  }
 0x2f3   :  { %v2353_v6 = vld [vmem:[#allocation4 + $0x1d0] ss:$8 sps:$4 sm:$0xff]   ;;  %v2358_v7 = vld [vmem:[#allocation4 + $0x1e4] ss:$8 sps:$4 sm:$0xff]   ;;  %v2356_v43 = vld [vmem:[#allocation4 + $0x1e0] ss:$8 sps:$4 sm:$0xff]  }
 0x2f4   :  { %v983_v16 = vmax.f32 %v979_v11, 0.0  ;;  %v985_v17 = vmax.f32 %v981_v14, 0.0  ;;  %v2679_v20 = vmax.f32 %v978_v15, 0.0  ;;  %v2681_v21 = vmax.f32 %v980_v12, 0.0  ;;  %v2361_v11 = vld [vmem:[#allocation4 + $0x1f4] ss:$8 sps:$4 sm:$0xff]  }
 0x2f5   :  { %v2359_v12 = vld [vmem:[#allocation4 + $0x1f0] ss:$8 sps:$4 sm:$0xff]   ;;  %v2364_v14 = vld [vmem:[#allocation4 + $0x204] ss:$8 sps:$4 sm:$0xff]   ;;  %v2362_v15 = vld [vmem:[#allocation4 + $0x200] ss:$8 sps:$4 sm:$0xff]  }
 0x2f6   :  { %v991_v10 = vrot.slane %v983_v16, 7  ;;  %v994_v42 = vrot.slane %v985_v17, 7  ;;  %v990_v13 = vrot.slane %v2679_v20, 7  ;;  %v992_v22 = vrot.slane %v2681_v21, 7 }
 0x2f7   :  { %v1121_v23 = vpack.c.bf16 %v985_v17, %v983_v16  ;;  %v1120_v9 = vpack.c.bf16 %v2681_v21, %v2679_v20  ;;  %v1009_v24 = vrot.slane %v983_v16, 1  ;;  %v1010_v25 = vrot.slane %v985_v17, 1  ;;  %v2367_v16 = vld [vmem:[#allocation4 + $0x214] ss:$8 sps:$4 sm:$0xff]   ;;  %v2365_v17 = vld [vmem:[#allocation4 + $0x210] ss:$8 sps:$4 sm:$0xff]  }
 0x2f8   :  { %v995_v27 = vsel %vm93_vm2, %v991_v10, %v994_v42  ;;  %v1001_v28 = vsel %vm93_vm2, 0.0, %v991_v10  ;;  %v993_v29 = vsel %vm93_vm2, %v990_v13, %v992_v22  ;;  %v1000_v30 = vsel %vm93_vm2, 0.0, %v990_v13  ;;  %v2370_v10 = vld [vmem:[#allocation4 + $0x224] ss:$8 sps:$4 sm:$0xff]   ;;  %v2368_v42 = vld [vmem:[#allocation4 + $0x220] ss:$8 sps:$4 sm:$0xff]  }
 0x2f9   :  { %v2088_v31 = vpack.c.bf16 %v995_v27, %v1001_v28  ;;  %v2091_v33 = vpack.c.bf16 %v993_v29, %v1000_v30  ;;  %v2692_v34 = vsel %vm114_vm7, %v1009_v24, %v1010_v25  ;;  %v2695_v18 = vsel %vm114_vm7, %v1010_v25, 0.0  ;;  %v2373_v13 = vld [vmem:[#allocation4 + $0x234] ss:$8 sps:$4 sm:$0xff]   ;;  %v2371_v22 = vld [vmem:[#allocation4 + $0x230] ss:$8 sps:$4 sm:$0xff]  }
 0x2fa   :  { %v2094_v35 = vpack.c.bf16 %v2695_v18, %v2692_v34  ;;  %v1006_v36 = vrot.slane %v2679_v20, 1  ;;  %v1007_v37 = vrot.slane %v2681_v21, 1  ;;  %v2374_v20 = vld [vmem:[#allocation4 + $0x240] ss:$8 sps:$4 sm:$0xff]   ;;  %v2379_v21 = vld [vmem:[#allocation4 + $0x254] ss:$8 sps:$4 sm:$0xff]  }
 0x2fb   :  { %2089 = vmatprep.mubr.msk.bf16.mxu1 %vm2563_vm3, %v2088_v31  ;;  %v2382_v24 = vld [vmem:[#allocation4 + $0x264] ss:$8 sps:$4 sm:$0xff]   ;;  %v2380_v25 = vld [vmem:[#allocation4 + $0x260] ss:$8 sps:$4 sm:$0xff]   ;;  %v2385_v27 = vld [vmem:[#allocation4 + $0x274] ss:$8 sps:$4 sm:$0xff]  }
 0x2fc   :  { %2092 = vmatmul.mubr.msk.bf16.vlgmr.msra.gmra.mrb[0].mxu1 %vm2563_vm3, %v2091_v33  ;;  %v2706_v38 = vsel %vm114_vm7, %v1006_v36, %v1007_v37  ;;  %v2709_v39 = vsel %vm114_vm7, %v1007_v37, 0.0  ;;  %v2383_v28 = vld [vmem:[#allocation4 + $0x270] ss:$8 sps:$4 sm:$0xff]   ;;  %v2388_v29 = vld [vmem:[#allocation4 + $0x284] ss:$8 sps:$4 sm:$0xff]  }
 0x2fd   :  { %1648 = vmatpush1.bf16.msra.mxu1 %v2314_v32  ;;  %1679 = vmatprep.mubr.bf16.mxu1 %v1121_v23  ;;  %v2097_v41 = vpack.c.bf16 %v2709_v39, %v2706_v38  ;;  %v2376_v23 = vld [vmem:[#allocation4 + $0x244] ss:$8 sps:$4 sm:$0xff]   ;;  %v2386_v30 = vld [vmem:[#allocation4 + $0x280] ss:$8 sps:$4 sm:$0xff]   ;;  %v2391_v31 = vld [vmem:[#allocation4 + $0x294] ss:$8 sps:$4 sm:$0xff]  }
 0x2fe   :  { %1649 = vmatprep.subr.bf16.mxu1 %v2319_v19  ;;  %v2389_v32 = vld [vmem:[#allocation4 + $0x290] ss:$8 sps:$4 sm:$0xff]   ;;  %v2394_v33 = vld [vmem:[#allocation4 + $0x2a4] ss:$8 sps:$4 sm:$0xff]   ;;  %v2392_v34 = vld [vmem:[#allocation4 + $0x2a0] ss:$8 sps:$4 sm:$0xff]  }
 0x2ff   :  { %v2397_v18 = vld [vmem:[#allocation4 + $0x2b4] ss:$8 sps:$4 sm:$0xff]   ;;  %v2395_v19 = vld [vmem:[#allocation4 + $0x2b0] ss:$8 sps:$4 sm:$0xff]   ;;  %v2398_v36 = vld [vmem:[#allocation4 + $0x2c0] ss:$8 sps:$4 sm:$0xff]  }
 0x300   :  { %v2403_v37 = vld [vmem:[#allocation4 + $0x2d4] ss:$8 sps:$4 sm:$0xff]  }
 0x301   :  { %1650 = vmatpush1.bf16.msra.mxu1 %v2317_v40  ;;  %v2401_v40 = vld [vmem:[#allocation4 + $0x2d0] ss:$8 sps:$4 sm:$0xff]  }
 0x302   :  { %1651 = vmatprep.subr.bf16.mxu1 %v2322_v44  ;;  %v2406_v44 = vld [vmem:[#allocation4 + $0x2e4] ss:$8 sps:$4 sm:$0xff]  }
 0x305   :  { %1652 = vmatpush1.bf16.msra.mxu1 %v2320_v45  ;;  %v2404_v45 = vld [vmem:[#allocation4 + $0x2e0] ss:$8 sps:$4 sm:$0xff]  }
 0x306   :  { %1653 = vmatprep.subr.bf16.mxu1 %v2325_v46  ;;  %v2409_v46 = vld [vmem:[#allocation4 + $0x2f4] ss:$8 sps:$4 sm:$0xff]  }
 0x309   :  { %1654 = vmatpush1.bf16.msra.mxu1 %v2323_v26  ;;  %v2407_v26 = vld [vmem:[#allocation4 + $0x2f0] ss:$8 sps:$4 sm:$0xff]  }
 0x30a   :  { %1655 = vmatprep.subr.bf16.mxu1 %v2328_v48 }
 0x30d   :  { %1656 = vmatpush1.bf16.msra.mxu1 %v2326_v49 }
 0x30e   :  { %1657 = vmatprep.subr.bf16.mxu1 %v2331_v51 }
 0x311   :  { %1658 = vmatpush1.bf16.msra.mxu1 %v2329_v52 }
 0x312   :  { %1659 = vmatprep.subr.bf16.mxu1 %v2334_v53 }
 0x315   :  { %1660 = vmatpush1.bf16.msra.mxu1 %v2332_v56 }
 0x316   :  { %1661 = vmatprep.subr.bf16.mxu1 %v2337_v58 }
 0x319   :  { %1662 = vmatpush1.bf16.msra.mxu1 %v2335_v59 }
 0x31a   :  { %1663 = vmatprep.subr.bf16.mxu1 %v2340_v60 }
 0x31d   :  { %1664 = vmatpush1.bf16.msra.mxu1 %v2338_v5 }
 0x31e   :  { %1665 = vmatprep.subr.bf16.mxu1 %v2343_v61 }
 0x321   :  { %1666 = vmatpush1.bf16.msra.mxu1 %v2341_v62 }
 0x322   :  { %1667 = vmatprep.subr.bf16.mxu1 %v2346_v63 }
 0x325   :  { %1668 = vmatpush1.bf16.msra.mxu1 %v2344_v0 }
 0x326   :  { %1669 = vmatprep.subr.bf16.mxu1 %v2349_v1 }
 0x329   :  { %1670 = vmatpush1.bf16.msra.mxu1 %v2347_v8 }
 0x32a   :  { %1671 = vmatprep.subr.bf16.mxu1 %v2352_v2 }
 0x32d   :  { %1672 = vmatpush1.bf16.msra.mxu1 %v2350_v3 }
 0x32e   :  { %1673 = vmatprep.subr.bf16.mxu1 %v2355_v4 }
 0x331   :  { %1674 = vmatpush1.bf16.msra.mxu1 %v2353_v6 }
 0x332   :  { %1675 = vmatprep.subr.bf16.mxu1 %v2358_v7 }
 0x335   :  { %1676 = vmatpush1.bf16.msra.mxu1 %v2356_v43 }
 0x336   :  { %1677 = vmatprep.subr.bf16.mxu1 %v2361_v11 }
 0x339   :  { %1678 = vmatpush1.bf16.msra.mxu1 %v2359_v12 }
 0x33a   :  { %1690 = vmatprep.subr.bf16.mxu1 %v2364_v14 }
 0x33c   :  { %1680 = vmatmul.mubr.bf16.vlgmr.msra.gmra.mrb[0].mxu1 %v1120_v9  ;;  %v2377_v9 = vld [vmem:[#allocation4 + $0x250] ss:$8 sps:$4 sm:$0xff]  }
 0x33d   :  { %1691 = vmatpush1.bf16.msra.mxu1 %v2362_v15  ;;  %2095 = vmatprep.mubr.msk.bf16.mxu1 %vm2589_vm6, %v2094_v35  ;;  %v2400_v35 = vld [vmem:[#allocation4 + $0x2c4] ss:$8 sps:$4 sm:$0xff]  }
 0x33e   :  { %1692 = vmatprep.subr.bf16.mxu1 %v2367_v16 }
 0x341   :  { %1693 = vmatpush1.bf16.msra.mxu1 %v2365_v17 }
 0x342   :  { %1694 = vmatprep.subr.bf16.mxu1 %v2370_v10 }
 0x345   :  { %1695 = vmatpush1.bf16.msra.mxu1 %v2368_v42 }
 0x346   :  { %1696 = vmatprep.subr.bf16.mxu1 %v2373_v13 }
 0x349   :  { %1697 = vmatpush1.bf16.msra.mxu1 %v2371_v22 }
 0x34a   :  { %1698 = vmatprep.subr.bf16.mxu1 %v2376_v23 }
 0x34d   :  { %1699 = vmatpush1.bf16.msra.mxu1 %v2374_v20 }
 0x34e   :  { %1700 = vmatprep.subr.bf16.mxu1 %v2379_v21 }
 0x351   :  { %1701 = vmatpush1.bf16.msra.mxu1 %v2377_v9 }
 0x352   :  { %1702 = vmatprep.subr.bf16.mxu1 %v2382_v24 }
 0x355   :  { %1703 = vmatpush1.bf16.msra.mxu1 %v2380_v25 }
 0x356   :  { %1704 = vmatprep.subr.bf16.mxu1 %v2385_v27 }
 0x359   :  { %1705 = vmatpush1.bf16.msra.mxu1 %v2383_v28 }
 0x35a   :  { %1706 = vmatprep.subr.bf16.mxu1 %v2388_v29 }
 0x35d   :  { %1707 = vmatpush1.bf16.msra.mxu1 %v2386_v30 }
 0x35e   :  { %1708 = vmatprep.subr.bf16.mxu1 %v2391_v31 }
 0x361   :  { %1709 = vmatpush1.bf16.msra.mxu1 %v2389_v32 }
 0x362   :  { %1710 = vmatprep.subr.bf16.mxu1 %v2394_v33 }
 0x365   :  { %1711 = vmatpush1.bf16.msra.mxu1 %v2392_v34 }
 0x366   :  { %1712 = vmatprep.subr.bf16.mxu1 %v2397_v18 }
 0x369   :  { %1713 = vmatpush1.bf16.msra.mxu1 %v2395_v19 }
 0x36a   :  { %1714 = vmatprep.subr.bf16.mxu1 %v2400_v35 }
 0x36d   :  { %1715 = vmatpush1.bf16.msra.mxu1 %v2398_v36 }
 0x36e   :  { %1716 = vmatprep.subr.bf16.mxu1 %v2403_v37 }
 0x371   :  { %1717 = vmatpush1.bf16.msra.mxu1 %v2401_v40 }
 0x372   :  { %1718 = vmatprep.subr.bf16.mxu1 %v2406_v44 }
 0x375   :  { %1719 = vmatpush1.bf16.msra.mxu1 %v2404_v45 }
 0x376   :  { %1720 = vmatprep.subr.bf16.mxu1 %v2409_v46 }
 0x379   :  { %1721 = vmatpush1.bf16.msra.mxu1 %v2407_v26 }
 0x37c   :  { %2098 = vmatmul.mubr.msk.bf16.vlgmr.msra.gmra.mrb[0].mxu1 %vm2589_vm6, %v2097_v41 }
 0x44f   :  { %v2726_v48 = vpop.f32.mrb[0].mxu1 }
 0x450   :  { %v2728_v49 = vpop.f32.mrb[1].mxu1  ;;  %v1749_v52 = vmul.f32 %v2726_v48, %v2726_v48 }
 0x451   :  { %v2730_v51 = vpop.f32.mrb[2].mxu1  ;;  %v1750_v57 = vmul.f32 %v2728_v49, %v2728_v49 }
 0x452   :  { %v1735_v53 = vadd.f32 %v2730_v51, %v2726_v48  ;;  %v1751_v56 = vmul.f32 %v2730_v51, %v2730_v51  ;;  %v2738_v58 = vpop.f32.mrb[3].mxu1 }
 0x453   :  { %v1742_v38 = vadd.f32 %v2738_v58, %v2728_v49  ;;  %v1752_v39 = vmul.f32 %v2738_v58, %v2738_v58 }
 0x454   :  { %v1736_v41 = vrot.slane %v1735_v53, 4  ;;  %v1753_v59 = vadd.f32 %v1751_v56, %v1749_v52 }
 0x455   :  { %v1743_v60 = vrot.slane %v1742_v38, 4  ;;  %v1760_v5 = vadd.f32 %v1752_v39, %v1750_v57 }
 0x456   :  { %v1737_v61 = vadd.f32 %v1736_v41, %v1735_v53  ;;  %v1754_v62 = vrot.slane %v1753_v59, 4 }
 0x457   :  { %v1744_v63 = vadd.f32 %v1743_v60, %v1742_v38  ;;  %v1761_v0 = vrot.slane %v1760_v5, 4 }
 0x458   :  { %v1738_v1 = vrot.slane %v1737_v61, 2  ;;  %v1755_v8 = vadd.f32 %v1754_v62, %v1753_v59 }
 0x459   :  { %v1745_v2 = vrot.slane %v1744_v63, 2  ;;  %v1762_v3 = vadd.f32 %v1761_v0, %v1760_v5  ;;  %v1734_v5 = vld [vmem:[%s2808_s6] sm:$0x3] }
 0x45a   :  { %v1739_v4 = vadd.f32 %v1738_v1, %v1737_v61  ;;  %v1756_v6 = vrot.slane %v1755_v8, 2 }
 0x45b   :  { %v1746_v7 = vadd.f32 %v1745_v2, %v1744_v63  ;;  %v1763_v43 = vrot.slane %v1762_v3, 2 }
 0x45c   :  { %v1740_v11 = vrot.slane %v1739_v4, 1  ;;  %v1757_v12 = vadd.f32 %v1756_v6, %v1755_v8 }
 0x45d   :  { %v1747_v14 = vrot.slane %v1746_v7, 1  ;;  %v1764_v15 = vadd.f32 %v1763_v43, %v1762_v3 }
 0x45e   :  { %v1758_v16 = vrot.slane %v1757_v12, 1  ;;  %v1741_v10 = vadd.f32 %v1740_v11, %v1739_v4 }
 0x45f   :  { %v1765_v17 = vrot.slane %v1764_v15, 1  ;;  %v1748_v13 = vadd.f32 %v1747_v14, %v1746_v7 }
 0x460   :  { %v1759_v42 = vadd.f32 %v1758_v16, %v1757_v12 }
 0x461   :  { %v1766_v22 = vadd.f32 %v1765_v17, %v1764_v15 }
 0x462   :  { %v1767_v23 = vsel %vm93_vm2, %v1741_v10, %v1759_v42 }
 0x463   :  { %1769 = vrot.lane.b32.xlu0 %v1767_v23, %s2470_s10  ;;  %v1768_v20 = vsel %vm93_vm2, %v1748_v13, %v1766_v22 }
 0x464   :  { %1771 = vrot.lane.b32.xlu1 %v1768_v20, %s2470_s10 }
 0x4d5   :  { %v1770_v21 = vpop.permute.xlu0 %1769 }
 0x4d6   :  { %v1772_v9 = vpop.permute.xlu1 %1771 }
 0x4d7   :  { %v1773_v24 = vsel %vm888_vm8, %v1770_v21, %v1772_v9  ;;  %v1774_v25 = vsel %vm888_vm8, %v1772_v9, %v1770_v21 }
 0x4d8   :  { %v1775_v27 = vadd.f32 %v1774_v25, %v1767_v23  ;;  %v1776_v28 = vadd.f32 %v1773_v24, %v1768_v20 }
 0x4da   :  { %1777 = vrot.lane.b32.xlu0 %v1775_v27, %s2471_s11  ;;  %1779 = vrot.lane.b32.xlu1 %v1776_v28, %s2471_s11 }
 0x54c   :  { %v1778_v29 = vpop.permute.xlu0 %1777  ;;  %v1780_v30 = vpop.permute.xlu1 %1779 }
 0x54d   :  { %v1781_v31 = vsel %vm897_vm9, %v1778_v29, %v1780_v30  ;;  %v1782_v32 = vsel %vm897_vm9, %v1780_v30, %v1778_v29 }
 0x54e   :  { %v1783_v33 = vadd.f32 %v1782_v32, %v1775_v27  ;;  %v1784_v34 = vadd.f32 %v1781_v31, %v1776_v28 }
 0x550   :  { %v1785_v18 = vadd.f32 %v1784_v34, %v1783_v33 }
 0x552   :  { %v1786_v19 = vmul.f32 0.0078125, %v1785_v18 }
 0x554   :  { %v1787_v35 = vmul.f32 %v1786_v19, %v1786_v19 }
 0x556   :  { %v1789_v36 = vrot.slane %v1787_v35, 7 }
 0x558   :  { %v1791_v37 = vsub.f32 %v1786_v19, %v1789_v36 }
 0x55a   :  { %v1792_v40 = vmax.f32 %v1791_v37, 0.0 }
 0x55c   :  { %v1793_v44 = vadd.f32 1e-05, %v1792_v40 }
 0x55e   :  { %2412 = vrsqrt.f32 %v1793_v44 }
 0x568   :  { %v2413_v45 = vpop.eup %2412 }
 0x569   :  { %v1796_v46 = vcombine.low %v2413_v45, %v2413_v45 }
 0x56b   :  { %v1803_v26 = vrot.slane %v1796_v46, %v2653_v47 }
 0x56d   :  { %v1804_v52 = vcombine.high %v1803_v26, %v1803_v26 }
 0x56f   :  { %v1811_v53 = vrot.slane %v1804_v52, %v2653_v47 }
 0x571   :  { %v1813_v56 = vmul.f32 %v1811_v53, %v1733_v50 }
 0x573   :  { %v1818_v57 = vrot.slane %v1813_v56, %v2660_v54  ;;  %v1822_v38 = vrot.slane %v1813_v56, %v2663_v55 }
 0x575   :  { %v1825_v39 = vmul.f32 %v1818_v57, %v1786_v19  ;;  %v1826_v41 = vmul.f32 %v1822_v38, %v1786_v19  ;;  %v1846_v63 = vmul.f32 %v1818_v57, %v2726_v48  ;;  %v1847_v0 = vmul.f32 %v1822_v38, %v2728_v49  ;;  %v2415_v48 = vld [vmem:[%s2802_s0 + $0x8] sm:$0xff] }
 0x576   :  { %v1848_v1 = vmul.f32 %v1818_v57, %v2730_v51  ;;  %v1849_v8 = vmul.f32 %v1822_v38, %v2738_v58 }
 0x577   :  { %v1829_v59 = vcombine.low %v1825_v39, %v1826_v41 }
 0x579   :  { %v1836_v60 = vrot.slane %v1829_v59, %v2653_v47 }
 0x57b   :  { %v1843_v61 = vrot.slane %v1836_v60, %v2653_v47  ;;  %v2414_v47 = vld [vmem:[%s2802_s0] sm:$0xff] }
 0x57d   :  { %v1845_v62 = vsub.f32 %v1734_v5, %v1843_v61 }
 0x57f   :  { %v1854_v2 = vrot.slane %v1845_v62, %v2660_v54  ;;  %v1858_v3 = vrot.slane %v1845_v62, %v2663_v55  ;;  %v2416_v54 = vld [vmem:[%s2802_s0 + $0x10] sm:$0xff]  ;;  %v2417_v55 = vld [vmem:[%s2802_s0 + $0x18] sm:$0xff] }
 0x581   :  { %v1861_v4 = vadd.f32 %v1854_v2, %v1846_v63  ;;  %v1862_v6 = vadd.f32 %v1858_v3, %v1847_v0  ;;  %v1863_v7 = vadd.f32 %v1854_v2, %v1848_v1  ;;  %v1864_v43 = vadd.f32 %v1858_v3, %v1849_v8 }
 0x583   :  { %v1865_v11 = vadd.f32 %v2414_v47, %v1861_v4  ;;  %v1866_v49 = vadd.f32 %v2415_v48, %v1862_v6  ;;  %v1867_v51 = vadd.f32 %v2416_v54, %v1863_v7  ;;  %v1868_v58 = vadd.f32 %v2417_v55, %v1864_v43 }
 0x585   :  { %v1869_v12 = vmax.f32 %v1865_v11, 0.0  ;;  %v1870_v14 = vmax.f32 %v1866_v49, 0.0  ;;  %v1871_v15 = vmax.f32 %v1867_v51, 0.0  ;;  %v1872_v16 = vmax.f32 %v1868_v58, 0.0 }
 0x587   :  { %1873 = vst [vmem:[%s2809_s7] sm:$0xff] %v1869_v12  ;;  %1874 = vst [vmem:[%s2809_s7 + $0x8] sm:$0xff] %v1870_v14 }
 0x588   :  { %1875 = vst [vmem:[%s2809_s7 + $0x10] sm:$0xff] %v1871_v15  ;;  %1876 = vst [vmem:[%s2809_s7 + $0x18] sm:$0xff] %v1872_v16 }
 0x589   :  { %1881 = vsyncpa [#allocation3], 1 }
 0x58a   :  { %1882 = vsyncpa [#allocation5], 1 }

</bundles_post_ra>
